<compile_context>
chip_gen: v7x
topology: tpu7x:2x2x1
jax: 0.10.0
libtpu: 0.0.40
codegen_flags: <defaults>
</compile_context>

<pallas_src>
import functools
import math

import jax
import jax.numpy as jnp
import numpy as np
from jax.experimental import pallas as pl
from jax.experimental.pallas import tpu as pltpu

VOCAB_SIZE = 18
EMBEDDING_D = 64
FEEDFORWARD_D = EMBEDDING_D * 1
MAX_SEQ_LEN = 2 * (30 * (30 + 2) + 2) + 3
N_HEADS = 8
N_LAYERS = 4
HEAD_D = EMBEDDING_D // N_HEADS
LN_EPS = 1e-5
RMS_EPS = 1e-5
NEG_INF = -1e30
VOCAB_PAD = 128          # lane-dense vocab head (store width multiple of 128)
Q_TILE = 256             # query tile; <=512 keeps the working set inside v7x's 64 MiB VMEM


def _layer_norm(x, w, b):
    mu = jnp.mean(x, axis=-1, keepdims=True)
    var = jnp.mean((x - mu) ** 2, axis=-1, keepdims=True)
    return (x - mu) * jax.lax.rsqrt(var + LN_EPS) * w + b


def transformer_kernel(x_ref, rmsw_ref, wqkv_ref, bqkv_ref, wo_ref, bo_ref,
                       ln1w_ref, ln1b_ref, w1_ref, b1_ref, w2_ref, b2_ref,
                       ln2w_ref, ln2b_ref, wout_ref, bout_ref,
                       o_ref, x_s, q_s, k_s, v_s, attn_s, *, tq):
    Tp = x_ref.shape[1]          # padded sequence length (multiple of tq)
    D = EMBEDDING_D
    n_tiles = Tp // tq

    # --- embedding RMSNorm (eps inside sqrt, elementwise weight) ---
    x0 = x_ref[0]
    x0 = x0 * jax.lax.rsqrt(jnp.mean(x0 * x0, axis=-1, keepdims=True) + RMS_EPS)
    x_s[...] = x0 * rmsw_ref[0]

    # per-head 0/1 column masks over D (avoids narrow per-head lane slices)
    lane = jax.lax.broadcasted_iota(jnp.int32, (1, D), 1)
    hm_b = [((lane >= h * HEAD_D) & (lane < (h + 1) * HEAD_D)).astype(jnp.bfloat16)
            for h in range(N_HEADS)]
    hm_f = [((lane >= h * HEAD_D) & (lane < (h + 1) * HEAD_D)).astype(jnp.float32)
            for h in range(N_HEADS)]

    def layer_body(_, carry):
        x = x_s[...]                                    # (Tp, D) f32
        xb = x.astype(jnp.bfloat16)

        # fused QKV projection; softmax scale already folded into the q slice
        qkv = jnp.dot(xb, wqkv_ref[...], preferred_element_type=jnp.float32)
        qkv = qkv + bqkv_ref[0]
        q_s[...] = qkv[:, 0:D].astype(jnp.bfloat16)
        k_s[...] = qkv[:, D:2 * D].astype(jnp.bfloat16)
        v_s[...] = qkv[:, 2 * D:3 * D].astype(jnp.bfloat16)

        k_all = k_s[...]
        v_all = v_s[...]

        def tile_body(t, c):
            q0 = pl.multiple_of(t * tq, tq)
            q_t = q_s[pl.ds(q0, tq), :]                 # (tq, D) bf16
            row = q0 + jax.lax.broadcasted_iota(jnp.int32, (tq, Tp), 0)
            col = jax.lax.broadcasted_iota(jnp.int32, (tq, Tp), 1)
            neg = jnp.where(col > row, NEG_INF, 0.0).astype(jnp.float32)

            acc = jnp.zeros((tq, D), jnp.float32)
            for h in range(N_HEADS):
                # (q*hm) contracted with k over full D == per-head contraction
                # (non-head dims of q are exactly zero).
                s = jax.lax.dot_general(q_t * hm_b[h], k_all,
                                        (((1,), (1,)), ((), ())),
                                        preferred_element_type=jnp.float32)
                s = s + neg
                s = s - jnp.max(s, axis=-1, keepdims=True)
                e = jnp.exp(s)
                p = e * pl.reciprocal(jnp.sum(e, axis=-1, keepdims=True), approx=True)
                ov = jnp.dot(p.astype(jnp.bfloat16), v_all,
                             preferred_element_type=jnp.float32)
                acc = acc + hm_f[h] * ov                # keep only head-h output columns
            attn_s[pl.ds(q0, tq), :] = acc
            return c

        jax.lax.fori_loop(0, n_tiles, tile_body, 0)

        proj = jnp.dot(attn_s[...].astype(jnp.bfloat16), wo_ref[...],
                       preferred_element_type=jnp.float32) + bo_ref[0]
        x = _layer_norm(x + proj, ln1w_ref[0], ln1b_ref[0])

        h1 = jnp.maximum(
            jnp.dot(x.astype(jnp.bfloat16), w1_ref[...],
                    preferred_element_type=jnp.float32) + b1_ref[0], 0.0)
        h2 = jnp.dot(h1.astype(jnp.bfloat16), w2_ref[...],
                     preferred_element_type=jnp.float32) + b2_ref[0]
        x = _layer_norm(x + h2, ln2w_ref[0], ln2b_ref[0])
        x_s[...] = x
        return carry

    # the PyTorch module applies the SAME layer (shared weights) N_LAYERS times
    jax.lax.fori_loop(0, N_LAYERS, layer_body, 0)

    # --- vocab head (padded to lane-dense 128 output columns) ---
    o_ref[0] = jnp.dot(x_s[...].astype(jnp.bfloat16), wout_ref[...],
                       preferred_element_type=jnp.float32) + bout_ref[0]


def init_params(key):
    ks = jax.random.split(key, 16)
    s = 0.02
    f32 = jnp.float32
    return dict(
        tok_emb=jax.random.normal(ks[0], (VOCAB_SIZE, EMBEDDING_D), f32) * s,
        pos_emb=jax.random.normal(ks[1], (MAX_SEQ_LEN, EMBEDDING_D), f32) * s,
        rms_w=jnp.ones((EMBEDDING_D,), f32),
        in_proj_w=jax.random.normal(ks[2], (3 * EMBEDDING_D, EMBEDDING_D), f32) * s,
        in_proj_b=jax.random.normal(ks[3], (3 * EMBEDDING_D,), f32) * s,
        out_proj_w=jax.random.normal(ks[4], (EMBEDDING_D, EMBEDDING_D), f32) * s,
        out_proj_b=jax.random.normal(ks[5], (EMBEDDING_D,), f32) * s,
        ln1_w=jnp.ones((EMBEDDING_D,), f32),
        ln1_b=jnp.zeros((EMBEDDING_D,), f32),
        lin1_w=jax.random.normal(ks[6], (FEEDFORWARD_D, EMBEDDING_D), f32) * s,
        lin1_b=jax.random.normal(ks[7], (FEEDFORWARD_D,), f32) * s,
        lin2_w=jax.random.normal(ks[8], (EMBEDDING_D, FEEDFORWARD_D), f32) * s,
        lin2_b=jax.random.normal(ks[9], (EMBEDDING_D,), f32) * s,
        ln2_w=jnp.ones((EMBEDDING_D,), f32),
        ln2_b=jnp.zeros((EMBEDDING_D,), f32),
        out_w=jax.random.normal(ks[10], (VOCAB_SIZE, EMBEDDING_D), f32) * s,
        out_b=jax.random.normal(ks[11], (VOCAB_SIZE,), f32) * s,
    )


def task_model_forward(tokens, p):
    """tokens: (T, B) int32, PyTorch layout. Returns (T, B, VOCAB_SIZE) f32."""
    T, B = tokens.shape
    D = EMBEDDING_D

    # glue: embedding gathers + positional add, then batch to the leading axis
    x = p['tok_emb'][tokens] + p['pos_emb'][:T][:, None, :]          # (T, B, D)
    x = jnp.transpose(x, (1, 0, 2)).astype(jnp.float32)              # (B, T, D)

    # pad the sequence to a sublane-aligned, tileable length; padded rows are
    # causally invisible to real rows and sliced off afterwards.
    T_pad = max(8, -(-T // 8) * 8)
    if T_pad > Q_TILE:
        T_pad = -(-T_pad // Q_TILE) * Q_TILE
        tq = Q_TILE
    else:
        tq = T_pad
    x = jnp.pad(x, ((0, 0), (0, T_pad - T), (0, 0)))

    # fused QKV weight with the softmax scale folded into the q slice
    wq, wk, wv = jnp.split(p['in_proj_w'], 3, axis=0)
    bq, bk, bv = jnp.split(p['in_proj_b'], 3, axis=0)
    scale = 1.0 / math.sqrt(HEAD_D)
    wqkv = jnp.concatenate([wq.T * scale, wk.T, wv.T], axis=1)       # (D, 3D)
    bqkv = jnp.concatenate([bq * scale, bk, bv]).reshape(1, -1)      # (1, 3D)

    # lane-dense (zero-padded) vocab head
    wout = jnp.zeros((D, VOCAB_PAD), jnp.float32).at[:, :VOCAB_SIZE].set(p['out_w'].T)
    bout = jnp.zeros((1, VOCAB_PAD), jnp.float32).at[:, :VOCAB_SIZE].set(p['out_b'][None, :])

    bf16 = jnp.bfloat16

    def r2(v):                                                       # 1-D -> (1, n)
        return v.reshape(1, -1)

    args = [
        x,
        r2(p['rms_w']),
        wqkv.astype(bf16), bqkv,
        p['out_proj_w'].T.astype(bf16), r2(p['out_proj_b']),
        r2(p['ln1_w']), r2(p['ln1_b']),
        p['lin1_w'].T.astype(bf16), r2(p['lin1_b']),
        p['lin2_w'].T.astype(bf16), r2(p['lin2_b']),
        r2(p['ln2_w']), r2(p['ln2_b']),
        wout.astype(bf16), bout,
    ]

    def full_spec(a):
        nd = a.ndim
        return pl.BlockSpec(a.shape, lambda b, _nd=nd: (0,) * _nd)

    in_specs = [pl.BlockSpec((1, T_pad, D), lambda b: (b, 0, 0))]
    in_specs += [full_spec(a) for a in args[1:]]

    out = pl.pallas_call(
        functools.partial(transformer_kernel, tq=tq),
        out_shape=jax.ShapeDtypeStruct((B, T_pad, VOCAB_PAD), jnp.float32),
        grid=(B,),
        in_specs=in_specs,
        out_specs=pl.BlockSpec((1, T_pad, VOCAB_PAD), lambda b: (b, 0, 0)),
        scratch_shapes=[
            pltpu.VMEM((T_pad, D), jnp.float32),     # activation carried across layers
            pltpu.VMEM((T_pad, D), jnp.bfloat16),    # q (scale folded in)
            pltpu.VMEM((T_pad, D), jnp.bfloat16),    # k
            pltpu.VMEM((T_pad, D), jnp.bfloat16),    # v
            pltpu.VMEM((T_pad, D), jnp.float32),     # attention output
        ],
        compiler_params=pltpu.CompilerParams(
            dimension_semantics=("parallel",),
            vmem_limit_bytes=32 * 1024 * 1024),
    )(*args)

    out = out[:, :T, :VOCAB_SIZE]                                    # (B, T, VOCAB)
    return jnp.transpose(out, (1, 0, 2))                             # (T, B, VOCAB)


def reference_forward(tokens, p):
    """Pure-JAX replica of the PyTorch forward (eval-mode dropout)."""
    T, B = tokens.shape
    x = p['tok_emb'][tokens] + p['pos_emb'][:T][:, None, :]          # (T, B, D)
    x = x * jax.lax.rsqrt(jnp.mean(x * x, -1, keepdims=True) + RMS_EPS) * p['rms_w']
    wq, wk, wv = jnp.split(p['in_proj_w'], 3, 0)
    bq, bk, bv = jnp.split(p['in_proj_b'], 3, 0)
    mask = jnp.triu(jnp.ones((T, T), bool), 1)

    def ln(v, w, b):
        mu = v.mean(-1, keepdims=True)
        var = ((v - mu) ** 2).mean(-1, keepdims=True)
        return (v - mu) / jnp.sqrt(var + LN_EPS) * w + b

    def layer(x):
        q = x @ wq.T + bq
        k = x @ wk.T + bk
        v = x @ wv.T + bv
        q = q.reshape(T, B, N_HEADS, HEAD_D).transpose(1, 2, 0, 3)
        k = k.reshape(T, B, N_HEADS, HEAD_D).transpose(1, 2, 0, 3)
        v = v.reshape(T, B, N_HEADS, HEAD_D).transpose(1, 2, 0, 3)
        s = (q @ jnp.swapaxes(k, -1, -2)) / math.sqrt(HEAD_D)
        s = s + jnp.where(mask, NEG_INF, 0.0)
        a = jax.nn.softmax(s, -1) @ v                                # (B, H, T, hd)
        a = a.transpose(2, 0, 1, 3).reshape(T, B, EMBEDDING_D)
        a = a @ p['out_proj_w'].T + p['out_proj_b']
        x = ln(x + a, p['ln1_w'], p['ln1_b'])
        h = jnp.maximum(x @ p['lin1_w'].T + p['lin1_b'], 0.0)
        h = h @ p['lin2_w'].T + p['lin2_b']
        x = ln(x + h, p['ln2_w'], p['ln2_b'])
        return x

    for _ in range(N_LAYERS):
        x = layer(x)
    return x @ p['out_w'].T + p['out_b']


if __name__ == "__main__":
    key = jax.random.PRNGKey(0)
    pkey, tkey = jax.random.split(key)
    params = init_params(pkey)

    T, B = 8, 2
    tokens = jax.random.randint(tkey, (T, B), 0, VOCAB_SIZE, dtype=jnp.int32)

    out = task_model_forward(tokens, params)
    out = jax.block_until_ready(out)
    assert out.shape == (T, B, VOCAB_SIZE)
    assert bool(jnp.all(jnp.isfinite(out)))

    ref = reference_forward(tokens, params)
    np.testing.assert_allclose(np.asarray(out), np.asarray(ref), rtol=5e-2, atol=5e-2)

    print("KERNEL_OK")
</pallas_src>

<mosaic_0001>
module attributes {stable_mosaic.version = 11 : i64} {
  func.func @transformer_kernel(%arg0: i32, %arg1: memref<1x8x64xf32, #tpu.memory_space<vmem>>, %arg2: memref<1x64xf32, #tpu.memory_space<vmem>>, %arg3: memref<64x192xbf16, #tpu.memory_space<vmem>>, %arg4: memref<1x192xf32, #tpu.memory_space<vmem>>, %arg5: memref<64x64xbf16, #tpu.memory_space<vmem>>, %arg6: memref<1x64xf32, #tpu.memory_space<vmem>>, %arg7: memref<1x64xf32, #tpu.memory_space<vmem>>, %arg8: memref<1x64xf32, #tpu.memory_space<vmem>>, %arg9: memref<64x64xbf16, #tpu.memory_space<vmem>>, %arg10: memref<1x64xf32, #tpu.memory_space<vmem>>, %arg11: memref<64x64xbf16, #tpu.memory_space<vmem>>, %arg12: memref<1x64xf32, #tpu.memory_space<vmem>>, %arg13: memref<1x64xf32, #tpu.memory_space<vmem>>, %arg14: memref<1x64xf32, #tpu.memory_space<vmem>>, %arg15: memref<64x128xbf16, #tpu.memory_space<vmem>>, %arg16: memref<1x128xf32, #tpu.memory_space<vmem>>, %arg17: memref<1x8x128xf32, #tpu.memory_space<vmem>>, %arg18: memref<8x64xf32, #tpu.memory_space<vmem>>, %arg19: memref<8x64xbf16, #tpu.memory_space<vmem>>, %arg20: memref<8x64xbf16, #tpu.memory_space<vmem>>, %arg21: memref<8x64xbf16, #tpu.memory_space<vmem>>, %arg22: memref<8x64xf32, #tpu.memory_space<vmem>>) attributes {dimension_semantics = [#tpu.dimension_semantics<parallel>], iteration_bounds = array<i64: 2>, scalar_prefetch = 0 : i64, scratch_operands = 5 : i64, tpu.core_type = #tpu.core_type<tc>, window_params = [{transform_indices = @transform_0, window_bounds = array<i64: 1, 8, 64>}, {pipeline_mode = #tpu.pipeline_mode<synchronous>, transform_indices = @transform_1, window_bounds = array<i64: 1, 64>}, {pipeline_mode = #tpu.pipeline_mode<synchronous>, transform_indices = @transform_2, window_bounds = array<i64: 64, 192>}, {pipeline_mode = #tpu.pipeline_mode<synchronous>, transform_indices = @transform_3, window_bounds = array<i64: 1, 192>}, {pipeline_mode = #tpu.pipeline_mode<synchronous>, transform_indices = @transform_4, window_bounds = array<i64: 64, 64>}, {pipeline_mode = #tpu.pipeline_mode<synchronous>, transform_indices = @transform_5, window_bounds = array<i64: 1, 64>}, {pipeline_mode = #tpu.pipeline_mode<synchronous>, transform_indices = @transform_6, window_bounds = array<i64: 1, 64>}, {pipeline_mode = #tpu.pipeline_mode<synchronous>, transform_indices = @transform_7, window_bounds = array<i64: 1, 64>}, {pipeline_mode = #tpu.pipeline_mode<synchronous>, transform_indices = @transform_8, window_bounds = array<i64: 64, 64>}, {pipeline_mode = #tpu.pipeline_mode<synchronous>, transform_indices = @transform_9, window_bounds = array<i64: 1, 64>}, {pipeline_mode = #tpu.pipeline_mode<synchronous>, transform_indices = @transform_10, window_bounds = array<i64: 64, 64>}, {pipeline_mode = #tpu.pipeline_mode<synchronous>, transform_indices = @transform_11, window_bounds = array<i64: 1, 64>}, {pipeline_mode = #tpu.pipeline_mode<synchronous>, transform_indices = @transform_12, window_bounds = array<i64: 1, 64>}, {pipeline_mode = #tpu.pipeline_mode<synchronous>, transform_indices = @transform_13, window_bounds = array<i64: 1, 64>}, {pipeline_mode = #tpu.pipeline_mode<synchronous>, transform_indices = @transform_14, window_bounds = array<i64: 64, 128>}, {pipeline_mode = #tpu.pipeline_mode<synchronous>, transform_indices = @transform_15, window_bounds = array<i64: 1, 128>}, {transform_indices = @transform_16, window_bounds = array<i64: 1, 8, 128>}]} {
    %c0 = arith.constant 0 : index
    %c0_0 = arith.constant 0 : index
    %c0_1 = arith.constant 0 : index
    %0 = vector.load %arg1[%c0, %c0_0, %c0_1] : memref<1x8x64xf32, #tpu.memory_space<vmem>>, vector<1x8x64xf32>
    %1 = vector.shape_cast %0 : vector<1x8x64xf32> to vector<8x64xf32>
    %2 = arith.mulf %1, %1 : vector<8x64xf32>
    %cst = arith.constant dense<0.000000e+00> : vector<8xf32>
    %3 = vector.multi_reduction <add>, %2, %cst [1] : vector<8x64xf32> to vector<8xf32>
    %4 = vector.shape_cast %3 : vector<8xf32> to vector<8x1xf32>
    %cst_2 = arith.constant 6.400000e+01 : f32
    %5 = vector.broadcast %cst_2 : f32 to vector<8x1xf32>
    %6 = arith.divf %4, %5 : vector<8x1xf32>
    %cst_3 = arith.constant 9.99999974E-6 : f32
    %7 = vector.broadcast %cst_3 : f32 to vector<8x1xf32>
    %8 = arith.addf %6, %7 : vector<8x1xf32>
    %9 = math.rsqrt %8 : vector<8x1xf32>
    %10 = vector.broadcast %9 : vector<8x1xf32> to vector<8x64xf32>
    %11 = arith.mulf %1, %10 : vector<8x64xf32>
    %c0_4 = arith.constant 0 : index
    %c0_5 = arith.constant 0 : index
    %12 = vector.load %arg2[%c0_4, %c0_5] : memref<1x64xf32, #tpu.memory_space<vmem>>, vector<1x64xf32>
    %13 = vector.shape_cast %12 : vector<1x64xf32> to vector<64xf32>
    %14 = vector.shape_cast %13 : vector<64xf32> to vector<1x64xf32>
    %15 = vector.broadcast %14 : vector<1x64xf32> to vector<8x64xf32>
    %16 = arith.mulf %11, %15 : vector<8x64xf32>
    %c0_6 = arith.constant 0 : index
    %c0_7 = arith.constant 0 : index
    %17 = vector.load %arg18[%c0_6, %c0_7] : memref<8x64xf32, #tpu.memory_space<vmem>>, vector<8x64xf32>
    tpu.vector_store %arg18[%c0_6, %c0_7], %16 {strides = array<i32>} : memref<8x64xf32, #tpu.memory_space<vmem>>, vector<8x64xf32>,
    %18 = tpu.iota {dimensions = array<i32: 1>} : vector<1x64xi32>
    %c0_i32 = arith.constant 0 : i32
    %19 = vector.broadcast %c0_i32 : i32 to vector<1x64xi32>
    %20 = arith.cmpi sge, %18, %19 : vector<1x64xi32>
    %c8_i32 = arith.constant 8 : i32
    %21 = vector.broadcast %c8_i32 : i32 to vector<1x64xi32>
    %22 = arith.cmpi slt, %18, %21 : vector<1x64xi32>
    %23 = arith.andi %20, %22 : vector<1x64xi1>
    %24 = arith.extui %23 : vector<1x64xi1> to vector<1x64xi32>
    %25 = arith.sitofp %24 : vector<1x64xi32> to vector<1x64xf32>
    %26 = arith.truncf %25 : vector<1x64xf32> to vector<1x64xbf16>
    %c8_i32_8 = arith.constant 8 : i32
    %27 = vector.broadcast %c8_i32_8 : i32 to vector<1x64xi32>
    %28 = arith.cmpi sge, %18, %27 : vector<1x64xi32>
    %c16_i32 = arith.constant 16 : i32
    %29 = vector.broadcast %c16_i32 : i32 to vector<1x64xi32>
    %30 = arith.cmpi slt, %18, %29 : vector<1x64xi32>
    %31 = arith.andi %28, %30 : vector<1x64xi1>
    %32 = arith.extui %31 : vector<1x64xi1> to vector<1x64xi32>
    %33 = arith.sitofp %32 : vector<1x64xi32> to vector<1x64xf32>
    %34 = arith.truncf %33 : vector<1x64xf32> to vector<1x64xbf16>
    %c16_i32_9 = arith.constant 16 : i32
    %35 = vector.broadcast %c16_i32_9 : i32 to vector<1x64xi32>
    %36 = arith.cmpi sge, %18, %35 : vector<1x64xi32>
    %c24_i32 = arith.constant 24 : i32
    %37 = vector.broadcast %c24_i32 : i32 to vector<1x64xi32>
    %38 = arith.cmpi slt, %18, %37 : vector<1x64xi32>
    %39 = arith.andi %36, %38 : vector<1x64xi1>
    %40 = arith.extui %39 : vector<1x64xi1> to vector<1x64xi32>
    %41 = arith.sitofp %40 : vector<1x64xi32> to vector<1x64xf32>
    %42 = arith.truncf %41 : vector<1x64xf32> to vector<1x64xbf16>
    %c24_i32_10 = arith.constant 24 : i32
    %43 = vector.broadcast %c24_i32_10 : i32 to vector<1x64xi32>
    %44 = arith.cmpi sge, %18, %43 : vector<1x64xi32>
    %c32_i32 = arith.constant 32 : i32
    %45 = vector.broadcast %c32_i32 : i32 to vector<1x64xi32>
    %46 = arith.cmpi slt, %18, %45 : vector<1x64xi32>
    %47 = arith.andi %44, %46 : vector<1x64xi1>
    %48 = arith.extui %47 : vector<1x64xi1> to vector<1x64xi32>
    %49 = arith.sitofp %48 : vector<1x64xi32> to vector<1x64xf32>
    %50 = arith.truncf %49 : vector<1x64xf32> to vector<1x64xbf16>
    %c32_i32_11 = arith.constant 32 : i32
    %51 = vector.broadcast %c32_i32_11 : i32 to vector<1x64xi32>
    %52 = arith.cmpi sge, %18, %51 : vector<1x64xi32>
    %c40_i32 = arith.constant 40 : i32
    %53 = vector.broadcast %c40_i32 : i32 to vector<1x64xi32>
    %54 = arith.cmpi slt, %18, %53 : vector<1x64xi32>
    %55 = arith.andi %52, %54 : vector<1x64xi1>
    %56 = arith.extui %55 : vector<1x64xi1> to vector<1x64xi32>
    %57 = arith.sitofp %56 : vector<1x64xi32> to vector<1x64xf32>
    %58 = arith.truncf %57 : vector<1x64xf32> to vector<1x64xbf16>
    %c40_i32_12 = arith.constant 40 : i32
    %59 = vector.broadcast %c40_i32_12 : i32 to vector<1x64xi32>
    %60 = arith.cmpi sge, %18, %59 : vector<1x64xi32>
    %c48_i32 = arith.constant 48 : i32
    %61 = vector.broadcast %c48_i32 : i32 to vector<1x64xi32>
    %62 = arith.cmpi slt, %18, %61 : vector<1x64xi32>
    %63 = arith.andi %60, %62 : vector<1x64xi1>
    %64 = arith.extui %63 : vector<1x64xi1> to vector<1x64xi32>
    %65 = arith.sitofp %64 : vector<1x64xi32> to vector<1x64xf32>
    %66 = arith.truncf %65 : vector<1x64xf32> to vector<1x64xbf16>
    %c48_i32_13 = arith.constant 48 : i32
    %67 = vector.broadcast %c48_i32_13 : i32 to vector<1x64xi32>
    %68 = arith.cmpi sge, %18, %67 : vector<1x64xi32>
    %c56_i32 = arith.constant 56 : i32
    %69 = vector.broadcast %c56_i32 : i32 to vector<1x64xi32>
    %70 = arith.cmpi slt, %18, %69 : vector<1x64xi32>
    %71 = arith.andi %68, %70 : vector<1x64xi1>
    %72 = arith.extui %71 : vector<1x64xi1> to vector<1x64xi32>
    %73 = arith.sitofp %72 : vector<1x64xi32> to vector<1x64xf32>
    %74 = arith.truncf %73 : vector<1x64xf32> to vector<1x64xbf16>
    %c56_i32_14 = arith.constant 56 : i32
    %75 = vector.broadcast %c56_i32_14 : i32 to vector<1x64xi32>
    %76 = arith.cmpi sge, %18, %75 : vector<1x64xi32>
    %c64_i32 = arith.constant 64 : i32
    %77 = vector.broadcast %c64_i32 : i32 to vector<1x64xi32>
    %78 = arith.cmpi slt, %18, %77 : vector<1x64xi32>
    %79 = arith.andi %76, %78 : vector<1x64xi1>
    %80 = arith.extui %79 : vector<1x64xi1> to vector<1x64xi32>
    %81 = arith.sitofp %80 : vector<1x64xi32> to vector<1x64xf32>
    %82 = arith.truncf %81 : vector<1x64xf32> to vector<1x64xbf16>
    %c0_i32_15 = arith.constant 0 : i32
    %83 = vector.broadcast %c0_i32_15 : i32 to vector<1x64xi32>
    %84 = arith.cmpi sge, %18, %83 : vector<1x64xi32>
    %c8_i32_16 = arith.constant 8 : i32
    %85 = vector.broadcast %c8_i32_16 : i32 to vector<1x64xi32>
    %86 = arith.cmpi slt, %18, %85 : vector<1x64xi32>
    %87 = arith.andi %84, %86 : vector<1x64xi1>
    %88 = arith.extui %87 : vector<1x64xi1> to vector<1x64xi32>
    %89 = arith.sitofp %88 : vector<1x64xi32> to vector<1x64xf32>
    %c8_i32_17 = arith.constant 8 : i32
    %90 = vector.broadcast %c8_i32_17 : i32 to vector<1x64xi32>
    %91 = arith.cmpi sge, %18, %90 : vector<1x64xi32>
    %c16_i32_18 = arith.constant 16 : i32
    %92 = vector.broadcast %c16_i32_18 : i32 to vector<1x64xi32>
    %93 = arith.cmpi slt, %18, %92 : vector<1x64xi32>
    %94 = arith.andi %91, %93 : vector<1x64xi1>
    %95 = arith.extui %94 : vector<1x64xi1> to vector<1x64xi32>
    %96 = arith.sitofp %95 : vector<1x64xi32> to vector<1x64xf32>
    %c16_i32_19 = arith.constant 16 : i32
    %97 = vector.broadcast %c16_i32_19 : i32 to vector<1x64xi32>
    %98 = arith.cmpi sge, %18, %97 : vector<1x64xi32>
    %c24_i32_20 = arith.constant 24 : i32
    %99 = vector.broadcast %c24_i32_20 : i32 to vector<1x64xi32>
    %100 = arith.cmpi slt, %18, %99 : vector<1x64xi32>
    %101 = arith.andi %98, %100 : vector<1x64xi1>
    %102 = arith.extui %101 : vector<1x64xi1> to vector<1x64xi32>
    %103 = arith.sitofp %102 : vector<1x64xi32> to vector<1x64xf32>
    %c24_i32_21 = arith.constant 24 : i32
    %104 = vector.broadcast %c24_i32_21 : i32 to vector<1x64xi32>
    %105 = arith.cmpi sge, %18, %104 : vector<1x64xi32>
    %c32_i32_22 = arith.constant 32 : i32
    %106 = vector.broadcast %c32_i32_22 : i32 to vector<1x64xi32>
    %107 = arith.cmpi slt, %18, %106 : vector<1x64xi32>
    %108 = arith.andi %105, %107 : vector<1x64xi1>
    %109 = arith.extui %108 : vector<1x64xi1> to vector<1x64xi32>
    %110 = arith.sitofp %109 : vector<1x64xi32> to vector<1x64xf32>
    %c32_i32_23 = arith.constant 32 : i32
    %111 = vector.broadcast %c32_i32_23 : i32 to vector<1x64xi32>
    %112 = arith.cmpi sge, %18, %111 : vector<1x64xi32>
    %c40_i32_24 = arith.constant 40 : i32
    %113 = vector.broadcast %c40_i32_24 : i32 to vector<1x64xi32>
    %114 = arith.cmpi slt, %18, %113 : vector<1x64xi32>
    %115 = arith.andi %112, %114 : vector<1x64xi1>
    %116 = arith.extui %115 : vector<1x64xi1> to vector<1x64xi32>
    %117 = arith.sitofp %116 : vector<1x64xi32> to vector<1x64xf32>
    %c40_i32_25 = arith.constant 40 : i32
    %118 = vector.broadcast %c40_i32_25 : i32 to vector<1x64xi32>
    %119 = arith.cmpi sge, %18, %118 : vector<1x64xi32>
    %c48_i32_26 = arith.constant 48 : i32
    %120 = vector.broadcast %c48_i32_26 : i32 to vector<1x64xi32>
    %121 = arith.cmpi slt, %18, %120 : vector<1x64xi32>
    %122 = arith.andi %119, %121 : vector<1x64xi1>
    %123 = arith.extui %122 : vector<1x64xi1> to vector<1x64xi32>
    %124 = arith.sitofp %123 : vector<1x64xi32> to vector<1x64xf32>
    %c48_i32_27 = arith.constant 48 : i32
    %125 = vector.broadcast %c48_i32_27 : i32 to vector<1x64xi32>
    %126 = arith.cmpi sge, %18, %125 : vector<1x64xi32>
    %c56_i32_28 = arith.constant 56 : i32
    %127 = vector.broadcast %c56_i32_28 : i32 to vector<1x64xi32>
    %128 = arith.cmpi slt, %18, %127 : vector<1x64xi32>
    %129 = arith.andi %126, %128 : vector<1x64xi1>
    %130 = arith.extui %129 : vector<1x64xi1> to vector<1x64xi32>
    %131 = arith.sitofp %130 : vector<1x64xi32> to vector<1x64xf32>
    %c56_i32_29 = arith.constant 56 : i32
    %132 = vector.broadcast %c56_i32_29 : i32 to vector<1x64xi32>
    %133 = arith.cmpi sge, %18, %132 : vector<1x64xi32>
    %c64_i32_30 = arith.constant 64 : i32
    %134 = vector.broadcast %c64_i32_30 : i32 to vector<1x64xi32>
    %135 = arith.cmpi slt, %18, %134 : vector<1x64xi32>
    %136 = arith.andi %133, %135 : vector<1x64xi1>
    %137 = arith.extui %136 : vector<1x64xi1> to vector<1x64xi32>
    %138 = arith.sitofp %137 : vector<1x64xi32> to vector<1x64xf32>
    %c0_i32_31 = arith.constant 0 : i32
    %c4_i32 = arith.constant 4 : i32
    %139 = arith.addi %c0_i32_31, %c4_i32 : i32
    %c1_i32 = arith.constant 1 : i32
    scf.for %arg23 = %c0_i32_31 to %139 step %c1_i32  : i32 {
      %c0_42 = arith.constant 0 : index
      %c0_43 = arith.constant 0 : index
      %152 = vector.load %arg18[%c0_42, %c0_43] : memref<8x64xf32, #tpu.memory_space<vmem>>, vector<8x64xf32>
      %153 = arith.truncf %152 : vector<8x64xf32> to vector<8x64xbf16>
      %c0_44 = arith.constant 0 : index
      %c0_45 = arith.constant 0 : index
      %154 = vector.load %arg3[%c0_44, %c0_45] : memref<64x192xbf16, #tpu.memory_space<vmem>>, vector<64x192xbf16>
      %cst_46 = arith.constant dense<0.000000e+00> : vector<8x192xf32>
      %155 = tpu.matmul %153, %154, %cst_46 {dimension_numbers = #tpu.dot_dimension_numbers<[1], [0], [0], [1], [0, 0, 1, 1], [], []>} : vector<8x64xbf16>, vector<64x192xbf16>, vector<8x192xf32> -> vector<8x192xf32>
      %c0_47 = arith.constant 0 : index
      %c0_48 = arith.constant 0 : index
      %156 = vector.load %arg4[%c0_47, %c0_48] : memref<1x192xf32, #tpu.memory_space<vmem>>, vector<1x192xf32>
      %157 = vector.shape_cast %156 : vector<1x192xf32> to vector<192xf32>
      %158 = vector.shape_cast %157 : vector<192xf32> to vector<1x192xf32>
      %159 = vector.broadcast %158 : vector<1x192xf32> to vector<8x192xf32>
      %160 = arith.addf %155, %159 : vector<8x192xf32>
      %161 = vector.extract_strided_slice %160 {offsets = [0, 0], sizes = [8, 64], strides = [1, 1]} : vector<8x192xf32> to vector<8x64xf32>
      %162 = arith.truncf %161 : vector<8x64xf32> to vector<8x64xbf16>
      %c0_49 = arith.constant 0 : index
      %c0_50 = arith.constant 0 : index
      %163 = vector.load %arg19[%c0_49, %c0_50] : memref<8x64xbf16, #tpu.memory_space<vmem>>, vector<8x64xbf16>
      tpu.vector_store %arg19[%c0_49, %c0_50], %162 {strides = array<i32>} : memref<8x64xbf16, #tpu.memory_space<vmem>>, vector<8x64xbf16>,
      %164 = vector.extract_strided_slice %160 {offsets = [0, 64], sizes = [8, 64], strides = [1, 1]} : vector<8x192xf32> to vector<8x64xf32>
      %165 = arith.truncf %164 : vector<8x64xf32> to vector<8x64xbf16>
      %c0_51 = arith.constant 0 : index
      %c0_52 = arith.constant 0 : index
      %166 = vector.load %arg20[%c0_51, %c0_52] : memref<8x64xbf16, #tpu.memory_space<vmem>>, vector<8x64xbf16>
      tpu.vector_store %arg20[%c0_51, %c0_52], %165 {strides = array<i32>} : memref<8x64xbf16, #tpu.memory_space<vmem>>, vector<8x64xbf16>,
      %167 = vector.extract_strided_slice %160 {offsets = [0, 128], sizes = [8, 64], strides = [1, 1]} : vector<8x192xf32> to vector<8x64xf32>
      %168 = arith.truncf %167 : vector<8x64xf32> to vector<8x64xbf16>
      %c0_53 = arith.constant 0 : index
      %c0_54 = arith.constant 0 : index
      %169 = vector.load %arg21[%c0_53, %c0_54] : memref<8x64xbf16, #tpu.memory_space<vmem>>, vector<8x64xbf16>
      tpu.vector_store %arg21[%c0_53, %c0_54], %168 {strides = array<i32>} : memref<8x64xbf16, #tpu.memory_space<vmem>>, vector<8x64xbf16>,
      %c0_55 = arith.constant 0 : index
      %c0_56 = arith.constant 0 : index
      %170 = vector.load %arg20[%c0_55, %c0_56] : memref<8x64xbf16, #tpu.memory_space<vmem>>, vector<8x64xbf16>
      %c0_57 = arith.constant 0 : index
      %c0_58 = arith.constant 0 : index
      %171 = vector.load %arg21[%c0_57, %c0_58] : memref<8x64xbf16, #tpu.memory_space<vmem>>, vector<8x64xbf16>
      %c0_i32_59 = arith.constant 0 : i32
      %c8_i32_60 = arith.constant 8 : i32
      %172 = arith.muli %c0_i32_59, %c8_i32_60 : i32
      %173 = tpu.assume_multiple %172, 8 : i32
      %174 = arith.index_cast %173 : i32 to index
      %c0_61 = arith.constant 0 : index
      %175 = vector.load %arg19[%174, %c0_61] : memref<8x64xbf16, #tpu.memory_space<vmem>>, vector<8x64xbf16>
      %176 = tpu.iota {dimensions = array<i32: 0>} : vector<8x8xi32>
      %177 = vector.broadcast %173 : i32 to vector<8x8xi32>
      %178 = arith.addi %177, %176 : vector<8x8xi32>
      %179 = tpu.iota {dimensions = array<i32: 1>} : vector<8x8xi32>
      %180 = arith.cmpi sgt, %179, %178 : vector<8x8xi32>
      %cst_62 = arith.constant -1.000000e+30 : f32
      %cst_63 = arith.constant 0.000000e+00 : f32
      %181 = vector.broadcast %cst_62 : f32 to vector<8x8xf32>
      %182 = vector.broadcast %cst_63 : f32 to vector<8x8xf32>
      %183 = arith.select %180, %181, %182 : vector<8x8xi1>, vector<8x8xf32>
      %cst_64 = arith.constant 0.000000e+00 : f32
      %184 = vector.broadcast %cst_64 : f32 to vector<8x64xf32>
      %185 = vector.broadcast %26 : vector<1x64xbf16> to vector<8x64xbf16>
      %186 = arith.mulf %175, %185 : vector<8x64xbf16>
      %cst_65 = arith.constant dense<0.000000e+00> : vector<8x8xf32>
      %187 = tpu.matmul %186, %170, %cst_65 {dimension_numbers = #tpu.dot_dimension_numbers<[1], [1], [0], [0], [0, 0, 1, 0], [], []>} : vector<8x64xbf16>, vector<8x64xbf16>, vector<8x8xf32> -> vector<8x8xf32>
      %188 = arith.addf %187, %183 : vector<8x8xf32>
      %cst_66 = arith.constant dense<0xFF800000> : vector<8xf32>
      %189 = vector.multi_reduction <maximumf>, %188, %cst_66 [1] : vector<8x8xf32> to vector<8xf32>
      %190 = vector.shape_cast %189 : vector<8xf32> to vector<8x1xf32>
      %191 = vector.broadcast %190 : vector<8x1xf32> to vector<8x8xf32>
      %192 = arith.subf %188, %191 : vector<8x8xf32>
      %193 = math.exp %192 : vector<8x8xf32>
      %cst_67 = arith.constant dense<0.000000e+00> : vector<8xf32>
      %194 = vector.multi_reduction <add>, %193, %cst_67 [1] : vector<8x8xf32> to vector<8xf32>
      %195 = vector.shape_cast %194 : vector<8xf32> to vector<8x1xf32>
      %196 = tpu.reciprocal %195 {approx = true} : vector<8x1xf32> -> vector<8x1xf32>
      %197 = vector.broadcast %196 : vector<8x1xf32> to vector<8x8xf32>
      %198 = arith.mulf %193, %197 : vector<8x8xf32>
      %199 = arith.truncf %198 : vector<8x8xf32> to vector<8x8xbf16>
      %cst_68 = arith.constant dense<0.000000e+00> : vector<8x64xf32>
      %200 = tpu.matmul %199, %171, %cst_68 {dimension_numbers = #tpu.dot_dimension_numbers<[1], [0], [0], [1], [0, 0, 1, 1], [], []>} : vector<8x8xbf16>, vector<8x64xbf16>, vector<8x64xf32> -> vector<8x64xf32>
      %201 = vector.broadcast %89 : vector<1x64xf32> to vector<8x64xf32>
      %202 = arith.mulf %201, %200 : vector<8x64xf32>
      %203 = arith.addf %184, %202 : vector<8x64xf32>
      %204 = vector.broadcast %34 : vector<1x64xbf16> to vector<8x64xbf16>
      %205 = arith.mulf %175, %204 : vector<8x64xbf16>
      %cst_69 = arith.constant dense<0.000000e+00> : vector<8x8xf32>
      %206 = tpu.matmul %205, %170, %cst_69 {dimension_numbers = #tpu.dot_dimension_numbers<[1], [1], [0], [0], [0, 0, 1, 0], [], []>} : vector<8x64xbf16>, vector<8x64xbf16>, vector<8x8xf32> -> vector<8x8xf32>
      %207 = arith.addf %206, %183 : vector<8x8xf32>
      %cst_70 = arith.constant dense<0xFF800000> : vector<8xf32>
      %208 = vector.multi_reduction <maximumf>, %207, %cst_70 [1] : vector<8x8xf32> to vector<8xf32>
      %209 = vector.shape_cast %208 : vector<8xf32> to vector<8x1xf32>
      %210 = vector.broadcast %209 : vector<8x1xf32> to vector<8x8xf32>
      %211 = arith.subf %207, %210 : vector<8x8xf32>
      %212 = math.exp %211 : vector<8x8xf32>
      %cst_71 = arith.constant dense<0.000000e+00> : vector<8xf32>
      %213 = vector.multi_reduction <add>, %212, %cst_71 [1] : vector<8x8xf32> to vector<8xf32>
      %214 = vector.shape_cast %213 : vector<8xf32> to vector<8x1xf32>
      %215 = tpu.reciprocal %214 {approx = true} : vector<8x1xf32> -> vector<8x1xf32>
      %216 = vector.broadcast %215 : vector<8x1xf32> to vector<8x8xf32>
      %217 = arith.mulf %212, %216 : vector<8x8xf32>
      %218 = arith.truncf %217 : vector<8x8xf32> to vector<8x8xbf16>
      %cst_72 = arith.constant dense<0.000000e+00> : vector<8x64xf32>
      %219 = tpu.matmul %218, %171, %cst_72 {dimension_numbers = #tpu.dot_dimension_numbers<[1], [0], [0], [1], [0, 0, 1, 1], [], []>} : vector<8x8xbf16>, vector<8x64xbf16>, vector<8x64xf32> -> vector<8x64xf32>
      %220 = vector.broadcast %96 : vector<1x64xf32> to vector<8x64xf32>
      %221 = arith.mulf %220, %219 : vector<8x64xf32>
      %222 = arith.addf %203, %221 : vector<8x64xf32>
      %223 = vector.broadcast %42 : vector<1x64xbf16> to vector<8x64xbf16>
      %224 = arith.mulf %175, %223 : vector<8x64xbf16>
      %cst_73 = arith.constant dense<0.000000e+00> : vector<8x8xf32>
      %225 = tpu.matmul %224, %170, %cst_73 {dimension_numbers = #tpu.dot_dimension_numbers<[1], [1], [0], [0], [0, 0, 1, 0], [], []>} : vector<8x64xbf16>, vector<8x64xbf16>, vector<8x8xf32> -> vector<8x8xf32>
      %226 = arith.addf %225, %183 : vector<8x8xf32>
      %cst_74 = arith.constant dense<0xFF800000> : vector<8xf32>
      %227 = vector.multi_reduction <maximumf>, %226, %cst_74 [1] : vector<8x8xf32> to vector<8xf32>
      %228 = vector.shape_cast %227 : vector<8xf32> to vector<8x1xf32>
      %229 = vector.broadcast %228 : vector<8x1xf32> to vector<8x8xf32>
      %230 = arith.subf %226, %229 : vector<8x8xf32>
      %231 = math.exp %230 : vector<8x8xf32>
      %cst_75 = arith.constant dense<0.000000e+00> : vector<8xf32>
      %232 = vector.multi_reduction <add>, %231, %cst_75 [1] : vector<8x8xf32> to vector<8xf32>
      %233 = vector.shape_cast %232 : vector<8xf32> to vector<8x1xf32>
      %234 = tpu.reciprocal %233 {approx = true} : vector<8x1xf32> -> vector<8x1xf32>
      %235 = vector.broadcast %234 : vector<8x1xf32> to vector<8x8xf32>
      %236 = arith.mulf %231, %235 : vector<8x8xf32>
      %237 = arith.truncf %236 : vector<8x8xf32> to vector<8x8xbf16>
      %cst_76 = arith.constant dense<0.000000e+00> : vector<8x64xf32>
      %238 = tpu.matmul %237, %171, %cst_76 {dimension_numbers = #tpu.dot_dimension_numbers<[1], [0], [0], [1], [0, 0, 1, 1], [], []>} : vector<8x8xbf16>, vector<8x64xbf16>, vector<8x64xf32> -> vector<8x64xf32>
      %239 = vector.broadcast %103 : vector<1x64xf32> to vector<8x64xf32>
      %240 = arith.mulf %239, %238 : vector<8x64xf32>
      %241 = arith.addf %222, %240 : vector<8x64xf32>
      %242 = vector.broadcast %50 : vector<1x64xbf16> to vector<8x64xbf16>
      %243 = arith.mulf %175, %242 : vector<8x64xbf16>
      %cst_77 = arith.constant dense<0.000000e+00> : vector<8x8xf32>
      %244 = tpu.matmul %243, %170, %cst_77 {dimension_numbers = #tpu.dot_dimension_numbers<[1], [1], [0], [0], [0, 0, 1, 0], [], []>} : vector<8x64xbf16>, vector<8x64xbf16>, vector<8x8xf32> -> vector<8x8xf32>
      %245 = arith.addf %244, %183 : vector<8x8xf32>
      %cst_78 = arith.constant dense<0xFF800000> : vector<8xf32>
      %246 = vector.multi_reduction <maximumf>, %245, %cst_78 [1] : vector<8x8xf32> to vector<8xf32>
      %247 = vector.shape_cast %246 : vector<8xf32> to vector<8x1xf32>
      %248 = vector.broadcast %247 : vector<8x1xf32> to vector<8x8xf32>
      %249 = arith.subf %245, %248 : vector<8x8xf32>
      %250 = math.exp %249 : vector<8x8xf32>
      %cst_79 = arith.constant dense<0.000000e+00> : vector<8xf32>
      %251 = vector.multi_reduction <add>, %250, %cst_79 [1] : vector<8x8xf32> to vector<8xf32>
      %252 = vector.shape_cast %251 : vector<8xf32> to vector<8x1xf32>
      %253 = tpu.reciprocal %252 {approx = true} : vector<8x1xf32> -> vector<8x1xf32>
      %254 = vector.broadcast %253 : vector<8x1xf32> to vector<8x8xf32>
      %255 = arith.mulf %250, %254 : vector<8x8xf32>
      %256 = arith.truncf %255 : vector<8x8xf32> to vector<8x8xbf16>
      %cst_80 = arith.constant dense<0.000000e+00> : vector<8x64xf32>
      %257 = tpu.matmul %256, %171, %cst_80 {dimension_numbers = #tpu.dot_dimension_numbers<[1], [0], [0], [1], [0, 0, 1, 1], [], []>} : vector<8x8xbf16>, vector<8x64xbf16>, vector<8x64xf32> -> vector<8x64xf32>
      %258 = vector.broadcast %110 : vector<1x64xf32> to vector<8x64xf32>
      %259 = arith.mulf %258, %257 : vector<8x64xf32>
      %260 = arith.addf %241, %259 : vector<8x64xf32>
      %261 = vector.broadcast %58 : vector<1x64xbf16> to vector<8x64xbf16>
      %262 = arith.mulf %175, %261 : vector<8x64xbf16>
      %cst_81 = arith.constant dense<0.000000e+00> : vector<8x8xf32>
      %263 = tpu.matmul %262, %170, %cst_81 {dimension_numbers = #tpu.dot_dimension_numbers<[1], [1], [0], [0], [0, 0, 1, 0], [], []>} : vector<8x64xbf16>, vector<8x64xbf16>, vector<8x8xf32> -> vector<8x8xf32>
      %264 = arith.addf %263, %183 : vector<8x8xf32>
      %cst_82 = arith.constant dense<0xFF800000> : vector<8xf32>
      %265 = vector.multi_reduction <maximumf>, %264, %cst_82 [1] : vector<8x8xf32> to vector<8xf32>
      %266 = vector.shape_cast %265 : vector<8xf32> to vector<8x1xf32>
      %267 = vector.broadcast %266 : vector<8x1xf32> to vector<8x8xf32>
      %268 = arith.subf %264, %267 : vector<8x8xf32>
      %269 = math.exp %268 : vector<8x8xf32>
      %cst_83 = arith.constant dense<0.000000e+00> : vector<8xf32>
      %270 = vector.multi_reduction <add>, %269, %cst_83 [1] : vector<8x8xf32> to vector<8xf32>
      %271 = vector.shape_cast %270 : vector<8xf32> to vector<8x1xf32>
      %272 = tpu.reciprocal %271 {approx = true} : vector<8x1xf32> -> vector<8x1xf32>
      %273 = vector.broadcast %272 : vector<8x1xf32> to vector<8x8xf32>
      %274 = arith.mulf %269, %273 : vector<8x8xf32>
      %275 = arith.truncf %274 : vector<8x8xf32> to vector<8x8xbf16>
      %cst_84 = arith.constant dense<0.000000e+00> : vector<8x64xf32>
      %276 = tpu.matmul %275, %171, %cst_84 {dimension_numbers = #tpu.dot_dimension_numbers<[1], [0], [0], [1], [0, 0, 1, 1], [], []>} : vector<8x8xbf16>, vector<8x64xbf16>, vector<8x64xf32> -> vector<8x64xf32>
      %277 = vector.broadcast %117 : vector<1x64xf32> to vector<8x64xf32>
      %278 = arith.mulf %277, %276 : vector<8x64xf32>
      %279 = arith.addf %260, %278 : vector<8x64xf32>
      %280 = vector.broadcast %66 : vector<1x64xbf16> to vector<8x64xbf16>
      %281 = arith.mulf %175, %280 : vector<8x64xbf16>
      %cst_85 = arith.constant dense<0.000000e+00> : vector<8x8xf32>
      %282 = tpu.matmul %281, %170, %cst_85 {dimension_numbers = #tpu.dot_dimension_numbers<[1], [1], [0], [0], [0, 0, 1, 0], [], []>} : vector<8x64xbf16>, vector<8x64xbf16>, vector<8x8xf32> -> vector<8x8xf32>
      %283 = arith.addf %282, %183 : vector<8x8xf32>
      %cst_86 = arith.constant dense<0xFF800000> : vector<8xf32>
      %284 = vector.multi_reduction <maximumf>, %283, %cst_86 [1] : vector<8x8xf32> to vector<8xf32>
      %285 = vector.shape_cast %284 : vector<8xf32> to vector<8x1xf32>
      %286 = vector.broadcast %285 : vector<8x1xf32> to vector<8x8xf32>
      %287 = arith.subf %283, %286 : vector<8x8xf32>
      %288 = math.exp %287 : vector<8x8xf32>
      %cst_87 = arith.constant dense<0.000000e+00> : vector<8xf32>
      %289 = vector.multi_reduction <add>, %288, %cst_87 [1] : vector<8x8xf32> to vector<8xf32>
      %290 = vector.shape_cast %289 : vector<8xf32> to vector<8x1xf32>
      %291 = tpu.reciprocal %290 {approx = true} : vector<8x1xf32> -> vector<8x1xf32>
      %292 = vector.broadcast %291 : vector<8x1xf32> to vector<8x8xf32>
      %293 = arith.mulf %288, %292 : vector<8x8xf32>
      %294 = arith.truncf %293 : vector<8x8xf32> to vector<8x8xbf16>
      %cst_88 = arith.constant dense<0.000000e+00> : vector<8x64xf32>
      %295 = tpu.matmul %294, %171, %cst_88 {dimension_numbers = #tpu.dot_dimension_numbers<[1], [0], [0], [1], [0, 0, 1, 1], [], []>} : vector<8x8xbf16>, vector<8x64xbf16>, vector<8x64xf32> -> vector<8x64xf32>
      %296 = vector.broadcast %124 : vector<1x64xf32> to vector<8x64xf32>
      %297 = arith.mulf %296, %295 : vector<8x64xf32>
      %298 = arith.addf %279, %297 : vector<8x64xf32>
      %299 = vector.broadcast %74 : vector<1x64xbf16> to vector<8x64xbf16>
      %300 = arith.mulf %175, %299 : vector<8x64xbf16>
      %cst_89 = arith.constant dense<0.000000e+00> : vector<8x8xf32>
      %301 = tpu.matmul %300, %170, %cst_89 {dimension_numbers = #tpu.dot_dimension_numbers<[1], [1], [0], [0], [0, 0, 1, 0], [], []>} : vector<8x64xbf16>, vector<8x64xbf16>, vector<8x8xf32> -> vector<8x8xf32>
      %302 = arith.addf %301, %183 : vector<8x8xf32>
      %cst_90 = arith.constant dense<0xFF800000> : vector<8xf32>
      %303 = vector.multi_reduction <maximumf>, %302, %cst_90 [1] : vector<8x8xf32> to vector<8xf32>
      %304 = vector.shape_cast %303 : vector<8xf32> to vector<8x1xf32>
      %305 = vector.broadcast %304 : vector<8x1xf32> to vector<8x8xf32>
      %306 = arith.subf %302, %305 : vector<8x8xf32>
      %307 = math.exp %306 : vector<8x8xf32>
      %cst_91 = arith.constant dense<0.000000e+00> : vector<8xf32>
      %308 = vector.multi_reduction <add>, %307, %cst_91 [1] : vector<8x8xf32> to vector<8xf32>
      %309 = vector.shape_cast %308 : vector<8xf32> to vector<8x1xf32>
      %310 = tpu.reciprocal %309 {approx = true} : vector<8x1xf32> -> vector<8x1xf32>
      %311 = vector.broadcast %310 : vector<8x1xf32> to vector<8x8xf32>
      %312 = arith.mulf %307, %311 : vector<8x8xf32>
      %313 = arith.truncf %312 : vector<8x8xf32> to vector<8x8xbf16>
      %cst_92 = arith.constant dense<0.000000e+00> : vector<8x64xf32>
      %314 = tpu.matmul %313, %171, %cst_92 {dimension_numbers = #tpu.dot_dimension_numbers<[1], [0], [0], [1], [0, 0, 1, 1], [], []>} : vector<8x8xbf16>, vector<8x64xbf16>, vector<8x64xf32> -> vector<8x64xf32>
      %315 = vector.broadcast %131 : vector<1x64xf32> to vector<8x64xf32>
      %316 = arith.mulf %315, %314 : vector<8x64xf32>
      %317 = arith.addf %298, %316 : vector<8x64xf32>
      %318 = vector.broadcast %82 : vector<1x64xbf16> to vector<8x64xbf16>
      %319 = arith.mulf %175, %318 : vector<8x64xbf16>
      %cst_93 = arith.constant dense<0.000000e+00> : vector<8x8xf32>
      %320 = tpu.matmul %319, %170, %cst_93 {dimension_numbers = #tpu.dot_dimension_numbers<[1], [1], [0], [0], [0, 0, 1, 0], [], []>} : vector<8x64xbf16>, vector<8x64xbf16>, vector<8x8xf32> -> vector<8x8xf32>
      %321 = arith.addf %320, %183 : vector<8x8xf32>
      %cst_94 = arith.constant dense<0xFF800000> : vector<8xf32>
      %322 = vector.multi_reduction <maximumf>, %321, %cst_94 [1] : vector<8x8xf32> to vector<8xf32>
      %323 = vector.shape_cast %322 : vector<8xf32> to vector<8x1xf32>
      %324 = vector.broadcast %323 : vector<8x1xf32> to vector<8x8xf32>
      %325 = arith.subf %321, %324 : vector<8x8xf32>
      %326 = math.exp %325 : vector<8x8xf32>
      %cst_95 = arith.constant dense<0.000000e+00> : vector<8xf32>
      %327 = vector.multi_reduction <add>, %326, %cst_95 [1] : vector<8x8xf32> to vector<8xf32>
      %328 = vector.shape_cast %327 : vector<8xf32> to vector<8x1xf32>
      %329 = tpu.reciprocal %328 {approx = true} : vector<8x1xf32> -> vector<8x1xf32>
      %330 = vector.broadcast %329 : vector<8x1xf32> to vector<8x8xf32>
      %331 = arith.mulf %326, %330 : vector<8x8xf32>
      %332 = arith.truncf %331 : vector<8x8xf32> to vector<8x8xbf16>
      %cst_96 = arith.constant dense<0.000000e+00> : vector<8x64xf32>
      %333 = tpu.matmul %332, %171, %cst_96 {dimension_numbers = #tpu.dot_dimension_numbers<[1], [0], [0], [1], [0, 0, 1, 1], [], []>} : vector<8x8xbf16>, vector<8x64xbf16>, vector<8x64xf32> -> vector<8x64xf32>
      %334 = vector.broadcast %138 : vector<1x64xf32> to vector<8x64xf32>
      %335 = arith.mulf %334, %333 : vector<8x64xf32>
      %336 = arith.addf %317, %335 : vector<8x64xf32>
      %337 = arith.index_cast %173 : i32 to index
      %c0_97 = arith.constant 0 : index
      %338 = vector.load %arg22[%337, %c0_97] : memref<8x64xf32, #tpu.memory_space<vmem>>, vector<8x64xf32>
      tpu.vector_store %arg22[%337, %c0_97], %336 {strides = array<i32>} : memref<8x64xf32, #tpu.memory_space<vmem>>, vector<8x64xf32>,
      %c1_i32_98 = arith.constant 1 : i32
      %c0_99 = arith.constant 0 : index
      %c0_100 = arith.constant 0 : index
      %339 = vector.load %arg22[%c0_99, %c0_100] : memref<8x64xf32, #tpu.memory_space<vmem>>, vector<8x64xf32>
      %340 = arith.truncf %339 : vector<8x64xf32> to vector<8x64xbf16>
      %c0_101 = arith.constant 0 : index
      %c0_102 = arith.constant 0 : index
      %341 = vector.load %arg5[%c0_101, %c0_102] : memref<64x64xbf16, #tpu.memory_space<vmem>>, vector<64x64xbf16>
      %cst_103 = arith.constant dense<0.000000e+00> : vector<8x64xf32>
      %342 = tpu.matmul %340, %341, %cst_103 {dimension_numbers = #tpu.dot_dimension_numbers<[1], [0], [0], [1], [0, 0, 1, 1], [], []>} : vector<8x64xbf16>, vector<64x64xbf16>, vector<8x64xf32> -> vector<8x64xf32>
      %c0_104 = arith.constant 0 : index
      %c0_105 = arith.constant 0 : index
      %343 = vector.load %arg6[%c0_104, %c0_105] : memref<1x64xf32, #tpu.memory_space<vmem>>, vector<1x64xf32>
      %344 = vector.shape_cast %343 : vector<1x64xf32> to vector<64xf32>
      %345 = vector.shape_cast %344 : vector<64xf32> to vector<1x64xf32>
      %346 = vector.broadcast %345 : vector<1x64xf32> to vector<8x64xf32>
      %347 = arith.addf %342, %346 : vector<8x64xf32>
      %348 = arith.addf %152, %347 : vector<8x64xf32>
      %c0_106 = arith.constant 0 : index
      %c0_107 = arith.constant 0 : index
      %349 = vector.load %arg7[%c0_106, %c0_107] : memref<1x64xf32, #tpu.memory_space<vmem>>, vector<1x64xf32>
      %350 = vector.shape_cast %349 : vector<1x64xf32> to vector<64xf32>
      %c0_108 = arith.constant 0 : index
      %c0_109 = arith.constant 0 : index
      %351 = vector.load %arg8[%c0_108, %c0_109] : memref<1x64xf32, #tpu.memory_space<vmem>>, vector<1x64xf32>
      %352 = vector.shape_cast %351 : vector<1x64xf32> to vector<64xf32>
      %cst_110 = arith.constant dense<0.000000e+00> : vector<8xf32>
      %353 = vector.multi_reduction <add>, %348, %cst_110 [1] : vector<8x64xf32> to vector<8xf32>
      %354 = vector.shape_cast %353 : vector<8xf32> to vector<8x1xf32>
      %cst_111 = arith.constant 6.400000e+01 : f32
      %355 = vector.broadcast %cst_111 : f32 to vector<8x1xf32>
      %356 = arith.divf %354, %355 : vector<8x1xf32>
      %357 = vector.broadcast %356 : vector<8x1xf32> to vector<8x64xf32>
      %358 = arith.subf %348, %357 : vector<8x64xf32>
      %359 = arith.mulf %358, %358 : vector<8x64xf32>
      %cst_112 = arith.constant dense<0.000000e+00> : vector<8xf32>
      %360 = vector.multi_reduction <add>, %359, %cst_112 [1] : vector<8x64xf32> to vector<8xf32>
      %361 = vector.shape_cast %360 : vector<8xf32> to vector<8x1xf32>
      %cst_113 = arith.constant 6.400000e+01 : f32
      %362 = vector.broadcast %cst_113 : f32 to vector<8x1xf32>
      %363 = arith.divf %361, %362 : vector<8x1xf32>
      %364 = vector.broadcast %356 : vector<8x1xf32> to vector<8x64xf32>
      %365 = arith.subf %348, %364 : vector<8x64xf32>
      %cst_114 = arith.constant 9.99999974E-6 : f32
      %366 = vector.broadcast %cst_114 : f32 to vector<8x1xf32>
      %367 = arith.addf %363, %366 : vector<8x1xf32>
      %368 = math.rsqrt %367 : vector<8x1xf32>
      %369 = vector.broadcast %368 : vector<8x1xf32> to vector<8x64xf32>
      %370 = arith.mulf %365, %369 : vector<8x64xf32>
      %371 = vector.shape_cast %350 : vector<64xf32> to vector<1x64xf32>
      %372 = vector.broadcast %371 : vector<1x64xf32> to vector<8x64xf32>
      %373 = arith.mulf %370, %372 : vector<8x64xf32>
      %374 = vector.shape_cast %352 : vector<64xf32> to vector<1x64xf32>
      %375 = vector.broadcast %374 : vector<1x64xf32> to vector<8x64xf32>
      %376 = arith.addf %373, %375 : vector<8x64xf32>
      %377 = arith.truncf %376 : vector<8x64xf32> to vector<8x64xbf16>
      %c0_115 = arith.constant 0 : index
      %c0_116 = arith.constant 0 : index
      %378 = vector.load %arg9[%c0_115, %c0_116] : memref<64x64xbf16, #tpu.memory_space<vmem>>, vector<64x64xbf16>
      %cst_117 = arith.constant dense<0.000000e+00> : vector<8x64xf32>
      %379 = tpu.matmul %377, %378, %cst_117 {dimension_numbers = #tpu.dot_dimension_numbers<[1], [0], [0], [1], [0, 0, 1, 1], [], []>} : vector<8x64xbf16>, vector<64x64xbf16>, vector<8x64xf32> -> vector<8x64xf32>
      %c0_118 = arith.constant 0 : index
      %c0_119 = arith.constant 0 : index
      %380 = vector.load %arg10[%c0_118, %c0_119] : memref<1x64xf32, #tpu.memory_space<vmem>>, vector<1x64xf32>
      %381 = vector.shape_cast %380 : vector<1x64xf32> to vector<64xf32>
      %382 = vector.shape_cast %381 : vector<64xf32> to vector<1x64xf32>
      %383 = vector.broadcast %382 : vector<1x64xf32> to vector<8x64xf32>
      %384 = arith.addf %379, %383 : vector<8x64xf32>
      %cst_120 = arith.constant 0.000000e+00 : f32
      %385 = vector.broadcast %cst_120 : f32 to vector<8x64xf32>
      %386 = arith.maximumf %384, %385 : vector<8x64xf32>
      %387 = arith.truncf %386 : vector<8x64xf32> to vector<8x64xbf16>
      %c0_121 = arith.constant 0 : index
      %c0_122 = arith.constant 0 : index
      %388 = vector.load %arg11[%c0_121, %c0_122] : memref<64x64xbf16, #tpu.memory_space<vmem>>, vector<64x64xbf16>
      %cst_123 = arith.constant dense<0.000000e+00> : vector<8x64xf32>
      %389 = tpu.matmul %387, %388, %cst_123 {dimension_numbers = #tpu.dot_dimension_numbers<[1], [0], [0], [1], [0, 0, 1, 1], [], []>} : vector<8x64xbf16>, vector<64x64xbf16>, vector<8x64xf32> -> vector<8x64xf32>
      %c0_124 = arith.constant 0 : index
      %c0_125 = arith.constant 0 : index
      %390 = vector.load %arg12[%c0_124, %c0_125] : memref<1x64xf32, #tpu.memory_space<vmem>>, vector<1x64xf32>
      %391 = vector.shape_cast %390 : vector<1x64xf32> to vector<64xf32>
      %392 = vector.shape_cast %391 : vector<64xf32> to vector<1x64xf32>
      %393 = vector.broadcast %392 : vector<1x64xf32> to vector<8x64xf32>
      %394 = arith.addf %389, %393 : vector<8x64xf32>
      %395 = arith.addf %376, %394 : vector<8x64xf32>
      %c0_126 = arith.constant 0 : index
      %c0_127 = arith.constant 0 : index
      %396 = vector.load %arg13[%c0_126, %c0_127] : memref<1x64xf32, #tpu.memory_space<vmem>>, vector<1x64xf32>
      %397 = vector.shape_cast %396 : vector<1x64xf32> to vector<64xf32>
      %c0_128 = arith.constant 0 : index
      %c0_129 = arith.constant 0 : index
      %398 = vector.load %arg14[%c0_128, %c0_129] : memref<1x64xf32, #tpu.memory_space<vmem>>, vector<1x64xf32>
      %399 = vector.shape_cast %398 : vector<1x64xf32> to vector<64xf32>
      %cst_130 = arith.constant dense<0.000000e+00> : vector<8xf32>
      %400 = vector.multi_reduction <add>, %395, %cst_130 [1] : vector<8x64xf32> to vector<8xf32>
      %401 = vector.shape_cast %400 : vector<8xf32> to vector<8x1xf32>
      %cst_131 = arith.constant 6.400000e+01 : f32
      %402 = vector.broadcast %cst_131 : f32 to vector<8x1xf32>
      %403 = arith.divf %401, %402 : vector<8x1xf32>
      %404 = vector.broadcast %403 : vector<8x1xf32> to vector<8x64xf32>
      %405 = arith.subf %395, %404 : vector<8x64xf32>
      %406 = arith.mulf %405, %405 : vector<8x64xf32>
      %cst_132 = arith.constant dense<0.000000e+00> : vector<8xf32>
      %407 = vector.multi_reduction <add>, %406, %cst_132 [1] : vector<8x64xf32> to vector<8xf32>
      %408 = vector.shape_cast %407 : vector<8xf32> to vector<8x1xf32>
      %cst_133 = arith.constant 6.400000e+01 : f32
      %409 = vector.broadcast %cst_133 : f32 to vector<8x1xf32>
      %410 = arith.divf %408, %409 : vector<8x1xf32>
      %411 = vector.broadcast %403 : vector<8x1xf32> to vector<8x64xf32>
      %412 = arith.subf %395, %411 : vector<8x64xf32>
      %cst_134 = arith.constant 9.99999974E-6 : f32
      %413 = vector.broadcast %cst_134 : f32 to vector<8x1xf32>
      %414 = arith.addf %410, %413 : vector<8x1xf32>
      %415 = math.rsqrt %414 : vector<8x1xf32>
      %416 = vector.broadcast %415 : vector<8x1xf32> to vector<8x64xf32>
      %417 = arith.mulf %412, %416 : vector<8x64xf32>
      %418 = vector.shape_cast %397 : vector<64xf32> to vector<1x64xf32>
      %419 = vector.broadcast %418 : vector<1x64xf32> to vector<8x64xf32>
      %420 = arith.mulf %417, %419 : vector<8x64xf32>
      %421 = vector.shape_cast %399 : vector<64xf32> to vector<1x64xf32>
      %422 = vector.broadcast %421 : vector<1x64xf32> to vector<8x64xf32>
      %423 = arith.addf %420, %422 : vector<8x64xf32>
      %c0_135 = arith.constant 0 : index
      %c0_136 = arith.constant 0 : index
      %424 = vector.load %arg18[%c0_135, %c0_136] : memref<8x64xf32, #tpu.memory_space<vmem>>, vector<8x64xf32>
      tpu.vector_store %arg18[%c0_135, %c0_136], %423 {strides = array<i32>} : memref<8x64xf32, #tpu.memory_space<vmem>>, vector<8x64xf32>,
    }
    %c0_32 = arith.constant 0 : index
    %c0_33 = arith.constant 0 : index
    %140 = vector.load %arg18[%c0_32, %c0_33] : memref<8x64xf32, #tpu.memory_space<vmem>>, vector<8x64xf32>
    %141 = arith.truncf %140 : vector<8x64xf32> to vector<8x64xbf16>
    %c0_34 = arith.constant 0 : index
    %c0_35 = arith.constant 0 : index
    %142 = vector.load %arg15[%c0_34, %c0_35] : memref<64x128xbf16, #tpu.memory_space<vmem>>, vector<64x128xbf16>
    %cst_36 = arith.constant dense<0.000000e+00> : vector<8x128xf32>
    %143 = tpu.matmul %141, %142, %cst_36 {dimension_numbers = #tpu.dot_dimension_numbers<[1], [0], [0], [1], [0, 0, 1, 1], [], []>} : vector<8x64xbf16>, vector<64x128xbf16>, vector<8x128xf32> -> vector<8x128xf32>
    %c0_37 = arith.constant 0 : index
    %c0_38 = arith.constant 0 : index
    %144 = vector.load %arg16[%c0_37, %c0_38] : memref<1x128xf32, #tpu.memory_space<vmem>>, vector<1x128xf32>
    %145 = vector.shape_cast %144 : vector<1x128xf32> to vector<128xf32>
    %146 = vector.shape_cast %145 : vector<128xf32> to vector<1x128xf32>
    %147 = vector.broadcast %146 : vector<1x128xf32> to vector<8x128xf32>
    %148 = arith.addf %143, %147 : vector<8x128xf32>
    %c0_39 = arith.constant 0 : index
    %c0_40 = arith.constant 0 : index
    %c0_41 = arith.constant 0 : index
    %149 = vector.load %arg17[%c0_39, %c0_40, %c0_41] : memref<1x8x128xf32, #tpu.memory_space<vmem>>, vector<1x8x128xf32>
    %150 = vector.shape_cast %149 : vector<1x8x128xf32> to vector<8x128xf32>
    %151 = vector.shape_cast %148 : vector<8x128xf32> to vector<1x8x128xf32>
    tpu.vector_store %arg17[%c0_39, %c0_40, %c0_41], %151 {strides = array<i32>} : memref<1x8x128xf32, #tpu.memory_space<vmem>>, vector<1x8x128xf32>,
    return
  }
  func.func @transform_0(%arg0: i32) -> (i32, i32, i32) {
    %c0_i32 = arith.constant 0 : i32
    %c0_i32_0 = arith.constant 0 : i32
    %c0_i32_1 = arith.constant 0 : i32
    return %arg0, %c0_i32, %c0_i32_0 : i32, i32, i32
  }
  func.func @transform_1(%arg0: i32) -> (i32, i32) {
    %c0_i32 = arith.constant 0 : i32
    %c0_i32_0 = arith.constant 0 : i32
    %c0_i32_1 = arith.constant 0 : i32
    return %c0_i32, %c0_i32_0 : i32, i32
  }
  func.func @transform_2(%arg0: i32) -> (i32, i32) {
    %c0_i32 = arith.constant 0 : i32
    %c0_i32_0 = arith.constant 0 : i32
    %c0_i32_1 = arith.constant 0 : i32
    return %c0_i32, %c0_i32_0 : i32, i32
  }
  func.func @transform_3(%arg0: i32) -> (i32, i32) {
    %c0_i32 = arith.constant 0 : i32
    %c0_i32_0 = arith.constant 0 : i32
    %c0_i32_1 = arith.constant 0 : i32
    return %c0_i32, %c0_i32_0 : i32, i32
  }
  func.func @transform_4(%arg0: i32) -> (i32, i32) {
    %c0_i32 = arith.constant 0 : i32
    %c0_i32_0 = arith.constant 0 : i32
    %c0_i32_1 = arith.constant 0 : i32
    return %c0_i32, %c0_i32_0 : i32, i32
  }
  func.func @transform_5(%arg0: i32) -> (i32, i32) {
    %c0_i32 = arith.constant 0 : i32
    %c0_i32_0 = arith.constant 0 : i32
    %c0_i32_1 = arith.constant 0 : i32
    return %c0_i32, %c0_i32_0 : i32, i32
  }
  func.func @transform_6(%arg0: i32) -> (i32, i32) {
    %c0_i32 = arith.constant 0 : i32
    %c0_i32_0 = arith.constant 0 : i32
    %c0_i32_1 = arith.constant 0 : i32
    return %c0_i32, %c0_i32_0 : i32, i32
  }
  func.func @transform_7(%arg0: i32) -> (i32, i32) {
    %c0_i32 = arith.constant 0 : i32
    %c0_i32_0 = arith.constant 0 : i32
    %c0_i32_1 = arith.constant 0 : i32
    return %c0_i32, %c0_i32_0 : i32, i32
  }
  func.func @transform_8(%arg0: i32) -> (i32, i32) {
    %c0_i32 = arith.constant 0 : i32
    %c0_i32_0 = arith.constant 0 : i32
    %c0_i32_1 = arith.constant 0 : i32
    return %c0_i32, %c0_i32_0 : i32, i32
  }
  func.func @transform_9(%arg0: i32) -> (i32, i32) {
    %c0_i32 = arith.constant 0 : i32
    %c0_i32_0 = arith.constant 0 : i32
    %c0_i32_1 = arith.constant 0 : i32
    return %c0_i32, %c0_i32_0 : i32, i32
  }
  func.func @transform_10(%arg0: i32) -> (i32, i32) {
    %c0_i32 = arith.constant 0 : i32
    %c0_i32_0 = arith.constant 0 : i32
    %c0_i32_1 = arith.constant 0 : i32
    return %c0_i32, %c0_i32_0 : i32, i32
  }
  func.func @transform_11(%arg0: i32) -> (i32, i32) {
    %c0_i32 = arith.constant 0 : i32
    %c0_i32_0 = arith.constant 0 : i32
    %c0_i32_1 = arith.constant 0 : i32
    return %c0_i32, %c0_i32_0 : i32, i32
  }
  func.func @transform_12(%arg0: i32) -> (i32, i32) {
    %c0_i32 = arith.constant 0 : i32
    %c0_i32_0 = arith.constant 0 : i32
    %c0_i32_1 = arith.constant 0 : i32
    return %c0_i32, %c0_i32_0 : i32, i32
  }
  func.func @transform_13(%arg0: i32) -> (i32, i32) {
    %c0_i32 = arith.constant 0 : i32
    %c0_i32_0 = arith.constant 0 : i32
    %c0_i32_1 = arith.constant 0 : i32
    return %c0_i32, %c0_i32_0 : i32, i32
  }
  func.func @transform_14(%arg0: i32) -> (i32, i32) {
    %c0_i32 = arith.constant 0 : i32
    %c0_i32_0 = arith.constant 0 : i32
    %c0_i32_1 = arith.constant 0 : i32
    return %c0_i32, %c0_i32_0 : i32, i32
  }
  func.func @transform_15(%arg0: i32) -> (i32, i32) {
    %c0_i32 = arith.constant 0 : i32
    %c0_i32_0 = arith.constant 0 : i32
    %c0_i32_1 = arith.constant 0 : i32
    return %c0_i32, %c0_i32_0 : i32, i32
  }
  func.func @transform_16(%arg0: i32) -> (i32, i32, i32) {
    %c0_i32 = arith.constant 0 : i32
    %c0_i32_0 = arith.constant 0 : i32
    %c0_i32_1 = arith.constant 0 : i32
    return %arg0, %c0_i32, %c0_i32_0 : i32, i32, i32
  }
}

</mosaic_0001>

<bundles_post_ra>
// kernel: tpu_custom_call.1
= control target key start
LH: loop header
LB: loop body
LE: loop exit
PB: predicated region body
PF: predicated region fallthrough
CT: control target
= control target key end

     0   :  { %s3701_s0 = inlined_call_operand.hbm [shape: f32[2,8,64], index: 0, kind: input, shape index: {}]   ;;  %s3702_s1 = inlined_call_operand.vmem [shape: f32[1,64], index: 1, kind: input, shape index: {}]   ;;  %s3703_s2 = inlined_call_operand.hbm [shape: bf16[64,192], index: 2, kind: input, shape index: {}]   ;;  %s3704_s3 = inlined_call_operand.vmem [shape: f32[1,192], index: 3, kind: input, shape index: {}]   ;;  %s3705_s4 = inlined_call_operand.hbm [shape: bf16[64,64], index: 4, kind: input, shape index: {}]   ;;  %s3706_s5 = inlined_call_operand.vmem [shape: f32[1,64], index: 5, kind: input, shape index: {}]   ;;  %s3707_s6 = inlined_call_operand.vmem [shape: f32[1,64], index: 6, kind: input, shape index: {}]   ;;  %s3708_s7 = inlined_call_operand.hbm [shape: f32[1,64], index: 7, kind: input, shape index: {}]   ;;  %s3709_s8 = inlined_call_operand.hbm [shape: bf16[64,64], index: 8, kind: input, shape index: {}]   ;;  %s3710_s9 = inlined_call_operand.hbm [shape: f32[1,64], index: 9, kind: input, shape index: {}]   ;;  %s3711_s10 = inlined_call_operand.vmem [shape: bf16[64,64], index: 10, kind: input, shape index: {}]   ;;  %s3712_s11 = inlined_call_operand.vmem [shape: f32[1,64], index: 11, kind: input, shape index: {}]   ;;  %s3713_s12 = inlined_call_operand.vmem [shape: f32[1,64], index: 12, kind: input, shape index: {}]   ;;  %s3714_s13 = inlined_call_operand.vmem [shape: f32[1,64], index: 13, kind: input, shape index: {}]   ;;  %s3715_s14 = inlined_call_operand.hbm [shape: bf16[64,128], index: 14, kind: input, shape index: {}]   ;;  %s3716_s15 = inlined_call_operand.vmem [shape: f32[1,128], index: 15, kind: input, shape index: {}]   ;;  %s3717_s16 = inlined_call_operand.hbm [shape: f32[2,8,128], index: 16, kind: output, shape index: {}]  }
   0x1   :  { %3724 = sst [smem:[#allocation25_spill]] %s3701_s0 }
   0x2   :  { %3725 = sst [smem:[#allocation26_spill]] %s3703_s2 }
   0x3   :  { %3726 = sst [smem:[#allocation27_spill]] %s3705_s4 }
   0x4   :  { %3727 = sst [smem:[#allocation28_spill]] %s3707_s6 }
   0x5   :  { %3728 = sst [smem:[#allocation29_spill]] %s3711_s10 }
   0x6   :  { %3729 = sst [smem:[#allocation30_spill]] %s3712_s11 }
   0x7   :  { %3730 = sst [smem:[#allocation31_spill]] %s3713_s12 }
   0x8   :  { %3731 = sst [smem:[#allocation32_spill]] %s3714_s13 }
   0x9   :  { %3732 = sst [smem:[#allocation33_spill]] %s3716_s15 }
   0xa   :  { %3733 = sst [smem:[#allocation34_spill]] %s3717_s16 }
   0xb   :  { %21 = vsyncpa [#allocation8], 0 }
   0xc   :  { %23 = vsyncpa [#allocation8 + $0x1], 0 }
   0xd   :  { %24 = vsyncpa [#allocation11], 0 }
   0xe   :  { %25 = vsyncpa [#allocation14], 0 }
   0xf   :  { %26 = vsyncpa [#allocation17], 0 }
  0x10   :  { %27 = vsyncpa [#allocation9], 0 }
  0x11   :  { %29 = vsyncpa [#allocation9 + $0x1], 0  ;;  %s3048_s21 = smov 0   ;;  %s3050_s22 = smov 0  }
  0x12   :  { %s3052_s23 = smov 0   ;;  %s3054_s24 = smov 0  }
  0x13 LB: > { %s2945_s25 = smov [#allocation10]   ;;  %s3069_s27 = sadd.s32 4294967295, %s2939_s24   ;;  %s2939_s24 = sphi %s3054_s24, %s3766_s24   ;;  %s2935_s23 = sphi %s3052_s23, %s3765_s23   ;;  %s2931_s22 = sphi %s3050_s22, %s3764_s22   ;;  %s2927_s21 = sphi %s3048_s21, %s3763_s21  }
  0x14   : > { %s422_s26 = sshll.u32 %s2945_s25, 4  ;;  %p2185_p0 = scmp.ge.s32.totalorder %s2939_s24, 1  ;;  %s3074_s26 = int_to_ptr.vmem [resolvable:$true] %s422_s26 }
  0x15   : > { %p3721_p1 = scmp.eq.s32.totalorder %s3069_s27, 0  ;;  %p407_p2 = scmp.lt.s32.totalorder %s2939_s24, 3 }
  0x16   : > { %s2946_s29 = smov [#allocation13]   ;;  %s2947_s17 = smov [#allocation16]  }
  0x17   : > { %p3076_p3 = pnand %p2185_p0, %p407_p2  ;;  %s458_s30 = sshll.u32 %s2946_s29, 4  ;;  %s3089_s30 = int_to_ptr.vmem [resolvable:$true] %s458_s30 }
  0x18   : > { %s482_s18 = sshll.u32 %s2947_s17, 4  ;;  %s3736_s2 = sld [smem:[#allocation26_spill]]  ;;  %s3091_s18 = int_to_ptr.vmem [resolvable:$true] %s482_s18 }
  0x19   : > { %s3734_s28 = scalar_select %p3076_p3, 1, 0 }
  0x1a   : > { %p2496_p5 = pneg %p3076_p3 }
  0x1c   : > { %p3085_p6 = pnand %p2496_p5, %p3721_p1 }
  0x1e   : > { %s2659_s25 = scalar_lea.hbm %s3736_s2, 1024  ;;  %p3101_p8 = pneg %p3085_p6 }
  0x1f   : > { %p2660_p7 = scmp.ne.s32.totalorder %s3736_s2, %s2659_s25  ;;  %p2666_p11 = scmp.lt.u32.totalorder %s2659_s25, %s3736_s2 }
  0x21   : > { %p2662_p9 = pnand %p3101_p8, %p2660_p7 }
  0x23   : > { %p2663_p10 = pneg %p2662_p9 }
  0x25   : > { %p2668_p12 = pnand %p2666_p11, %p2663_p10 }
  0x27   : > { %2671 = shalt.err (!%p2668_p12)
}
  0x28   : > { %s2672_s15 = scalar_lea.vmem %s3074_s26, 1024  ;;  %p2680_p5 = scmp.lt.s32.totalorder %s3074_s26, %s3074_s26 }
  0x29   : > { %p2673_p13 = scmp.ne.s32.totalorder %s3074_s26, %s2672_s15  ;;  %p2681_p4 = scmp.lt.s32.totalorder %s2672_s15, %s2672_s15 }
  0x2b   : > { %p2675_p0 = pnand %p2673_p13, %p3101_p8  ;;  %p2682_p7 = por %p2681_p4, %p2680_p5 }
  0x2d   : > { %p2676_p2 = pneg %p2675_p0 }
  0x2f   : > { %p2683_p9 = pnand %p2682_p7, %p2676_p2 }
  0x31   : > { %2686 = shalt.err (!%p2683_p9)
}
  0x32   : > { %s2948_s16 = smov 128   ;;  %s2949_s13 = smov 8  }
  0x33   : > { %2499 = dma.hbm_to_vmem [thread:$0]  (!%p3085_p6), %s3736_s2, 1024, %s3074_s26, [#allocation11], %s2948_s16, %s2948_s16, %s2949_s13  }
  0x34   : > { %s2687_s12 = scalar_lea.hbm %s3708_s7, 16 }
  0x35   : > { %p2688_p4 = scmp.ne.s32.totalorder %s3708_s7, %s2687_s12  ;;  %p2694_p12 = scmp.lt.u32.totalorder %s2687_s12, %s3708_s7 }
  0x37   : > { %p2690_p10 = pnand %p2688_p4, %p3101_p8 }
  0x39   : > { %p2691_p11 = pneg %p2690_p10 }
  0x3b   : > { %p2696_p13 = pnand %p2694_p12, %p2691_p11 }
  0x3d   : > { %2699 = shalt.err (!%p2696_p13)
}
  0x3e   : > { %s2700_s26 = scalar_lea.vmem %s3089_s30, 16  ;;  %s2707_s6 = scalar_lea.vmem %s3089_s30, 32 }
  0x3f   : > { %p2701_p0 = scmp.ne.s32.totalorder %s3089_s30, %s2700_s26  ;;  %p2708_p7 = scmp.lt.s32.totalorder %s3089_s30, %s3089_s30 }
  0x40   : > { %p2709_p9 = scmp.lt.s32.totalorder %s2707_s6, %s2700_s26 }
  0x41   : > { %p2703_p2 = pnand %p2701_p0, %p3101_p8 }
  0x42   : > { %p2710_p4 = por %p2709_p9, %p2708_p7 }
  0x43   : > { %p2704_p5 = pneg %p2703_p2 }
  0x45   : > { %p2711_p10 = pnand %p2710_p4, %p2704_p5 }
  0x47   : > { %2714 = shalt.err (!%p2711_p10)
}
  0x48   : > { %2505 = dma.hbm_to_vmem [thread:$0]  (!%p3085_p6), %s3708_s7, 16, %s3089_s30, [#allocation14]  }
  0x49   : > { %s2715_s13 = scalar_lea.hbm %s3710_s9, 16 }
  0x4a   : > { %p2716_p11 = scmp.ne.s32.totalorder %s3710_s9, %s2715_s13  ;;  %p2722_p0 = scmp.lt.u32.totalorder %s2715_s13, %s3710_s9 }
  0x4c   : > { %p2718_p12 = pnand %p2716_p11, %p3101_p8 }
  0x4e   : > { %p2719_p13 = pneg %p2718_p12 }
  0x50   : > { %p2724_p2 = pnand %p2722_p0, %p2719_p13 }
  0x52   : > { %2727 = shalt.err (!%p2724_p2)
}
  0x53   : > { %s2728_s30 = scalar_lea.vmem %s3091_s18, 16  ;;  %s2735_s15 = scalar_lea.vmem %s3091_s18, 32 }
  0x54   : > { %p2729_p5 = scmp.ne.s32.totalorder %s3091_s18, %s2728_s30  ;;  %p2736_p4 = scmp.lt.s32.totalorder %s3091_s18, %s3091_s18 }
  0x55   : > { %p2737_p10 = scmp.lt.s32.totalorder %s2735_s15, %s2728_s30 }
  0x56   : > { %p2731_p7 = pnand %p2729_p5, %p3101_p8 }
  0x57   : > { %p2738_p11 = por %p2737_p10, %p2736_p4 }
  0x58   : > { %p2732_p9 = pneg %p2731_p7 }
  0x5a   : > { %p2739_p12 = pnand %p2738_p11, %p2732_p9 }
  0x5c   : > { %2742 = shalt.err (!%p2739_p12)
}
  0x5d   : > { %2511 = dma.hbm_to_vmem [thread:$0]  (!%p3085_p6), %s3710_s9, 16, %s3091_s18, [#allocation17]  }
  0x5e   : > { %s2950_s10 = smov [#allocation12]   ;;  %s3738_s4 = sld [smem:[#allocation27_spill]] }
  0x5f   : > { %s438_s11 = sshll.u32 %s2950_s10, 4  ;;  %s439_s11 = int_to_ptr.vmem [resolvable:$true] %s438_s11 }
  0x64   : > { %s2743_s13 = scalar_lea.hbm %s3738_s4, 512 }
  0x65   : > { %p2744_p13 = scmp.ne.s32.totalorder %s3738_s4, %s2743_s13  ;;  %p2750_p5 = scmp.lt.u32.totalorder %s2743_s13, %s3738_s4 }
  0x67   : > { %p2746_p0 = pnand %p2744_p13, %p3101_p8 }
  0x69   : > { %p2747_p2 = pneg %p2746_p0 }
  0x6b   : > { %p2752_p7 = pnand %p2750_p5, %p2747_p2 }
  0x6d   : > { %2755 = shalt.err (!%p2752_p7)
}
  0x6e   : > { %s2756_s18 = scalar_lea.vmem %s439_s11, 512  ;;  %p2764_p11 = scmp.lt.s32.totalorder %s439_s11, %s439_s11 }
  0x6f   : > { %p2757_p9 = scmp.ne.s32.totalorder %s439_s11, %s2756_s18  ;;  %p2765_p12 = scmp.lt.s32.totalorder %s2756_s18, %s2756_s18 }
  0x71   : > { %p2759_p4 = pnand %p2757_p9, %p3101_p8  ;;  %p2766_p1 = por %p2765_p12, %p2764_p11 }
  0x73   : > { %p2760_p10 = pneg %p2759_p4 }
  0x75   : > { %p2767_p3 = pnand %p2766_p1, %p2760_p10 }
  0x77   : > { %2770 = shalt.err (!%p2767_p3)
}
  0x78   : > { %s2951_s30 = smov 64   ;;  %s2952_s15 = smov 4  }
  0x79   : > { %2502 = dma.hbm_to_vmem [thread:$0]  (!%p3085_p6), %s3738_s4, 512, %s439_s11, [#allocation11], %s2951_s30, %s2951_s30, %s2952_s15  }
  0x7a   : > { %s2953_s10 = smov [#allocation15]   ;;  %s2954_s16 = smov [#allocation18]  }
  0x7b   : > { %s468_s12 = sshll.u32 %s2953_s10, 4  ;;  %s504_s13 = sshll.u32 %s2954_s16, 4  ;;  %s469_s12 = int_to_ptr.vmem [resolvable:$true] %s468_s12  ;;  %s3191_s13 = int_to_ptr.vmem [resolvable:$true] %s504_s13 }
  0x7c   : > { %s2771_s25 = scalar_lea.hbm %s3709_s8, 512 }
  0x7d   : > { %p2772_p1 = scmp.ne.s32.totalorder %s3709_s8, %s2771_s25  ;;  %p2778_p0 = scmp.lt.u32.totalorder %s2771_s25, %s3709_s8 }
  0x7f   : > { %p2774_p3 = pnand %p2772_p1, %p3101_p8 }
  0x81   : > { %p2775_p13 = pneg %p2774_p3 }
  0x83   : > { %p2780_p2 = pnand %p2778_p0, %p2775_p13 }
  0x85   : > { %2783 = shalt.err (!%p2780_p2)
}
  0x86   : > { %s2784_s6 = scalar_lea.vmem %s469_s12, 512  ;;  %p2792_p4 = scmp.lt.s32.totalorder %s469_s12, %s469_s12 }
  0x87   : > { %p2785_p5 = scmp.ne.s32.totalorder %s469_s12, %s2784_s6  ;;  %p2793_p10 = scmp.lt.s32.totalorder %s2784_s6, %s2784_s6 }
  0x89   : > { %p2787_p7 = pnand %p2785_p5, %p3101_p8  ;;  %p2794_p11 = por %p2793_p10, %p2792_p4 }
  0x8b   : > { %p2788_p9 = pneg %p2787_p7 }
  0x8d   : > { %p2795_p12 = pnand %p2794_p11, %p2788_p9 }
  0x8f   : > { %2798 = shalt.err (!%p2795_p12)
}
  0x90   : > { %2508 = dma.hbm_to_vmem [thread:$0]  (!%p3085_p6), %s3709_s8, 512, %s469_s12, [#allocation14], %s2951_s30, %s2951_s30, %s2952_s15  }
  0x91   : > { %s2799_s25 = scalar_lea.hbm %s3715_s14, 512 }
  0x92   : > { %p2800_p1 = scmp.ne.s32.totalorder %s3715_s14, %s2799_s25  ;;  %p2806_p0 = scmp.lt.u32.totalorder %s2799_s25, %s3715_s14 }
  0x94   : > { %p2802_p3 = pnand %p2800_p1, %p3101_p8 }
  0x96   : > { %p2803_p13 = pneg %p2802_p3 }
  0x98   : > { %p2808_p2 = pnand %p2806_p0, %p2803_p13 }
  0x9a   : > { %2811 = shalt.err (!%p2808_p2)
}
  0x9b   : > { %s2812_s12 = scalar_lea.vmem %s3191_s13, 512  ;;  %p2820_p4 = scmp.lt.s32.totalorder %s3191_s13, %s3191_s13 }
  0x9c   : > { %p2813_p5 = scmp.ne.s32.totalorder %s3191_s13, %s2812_s12  ;;  %p2821_p10 = scmp.lt.s32.totalorder %s2812_s12, %s2812_s12 }
  0x9e   : > { %p2815_p7 = pnand %p2813_p5, %p3101_p8  ;;  %p2822_p11 = por %p2821_p10, %p2820_p4 }
  0xa0   : > { %p2816_p9 = pneg %p2815_p7 }
  0xa2   : > { %p2823_p12 = pnand %p2822_p11, %p2816_p9 }
  0xa4   : > { %2826 = shalt.err (!%p2823_p12)
}
  0xa5   : > { %2514 = dma.hbm_to_vmem [thread:$0]  (!%p3085_p6), %s3715_s14, 512, %s3191_s13, [#allocation17], %s2951_s30, %s2951_s30, %s2952_s15  }
  0xa6   : > { %s2184_s0 = sadd.s32 4294967294, %s2939_s24   ;;  %s3242_s29 = sadd.s32 1, %s2939_s24  }
  0xa7   : > { %s39_s16 = ssub.s32 %s2939_s24, %s3242_s29  ;;  %s42_s19 = sadd.s32 1, %s2935_s23 }
  0xa8   : > { %p40_p8 = scmp.eq.s32.totalorder %s39_s16, 0  ;;  %p49_p1 = scmp.ne.s32.totalorder %s2935_s23, %s2931_s22 }
  0xa9   : > { %p50_p3 = scmp.eq.s32.totalorder %s2939_s24, 0  ;;  %p55_p13 = scmp.ne.s32.totalorder %s2931_s22, %s2927_s21 }
  0xaa   : > { %s3253_s20 = scalar_select %p40_p8, %s2935_s23, %s42_s19  }
  0xab   : > { %p3255_p0 = por %p50_p3, %p49_p1  ;;  %p3740_p2 = scmp.eq.s32.totalorder %s3069_s27, 0 }
  0xac   : > { %p394_p5 = scmp.eq.s32.totalorder %s3069_s27, 1  ;;  %p400_p7 = scmp.eq.s32.totalorder %s2184_s0, 1 }
  0xad   : > { %p3261_p6 = por %p3740_p2, %p55_p13  ;;  %p2529_p9 = scmp.lt.s32.totalorder %s2939_s24, 2 }
  0xae   : > { %s521_s15 = sand.u32 1, %s2935_s23   ;;  %p3268_p4 = por %p394_p5, %p49_p1 }
  0xaf   : > { %p3272_p10 = por %p400_p7, %p55_p13  ;;  %s2193_s18 = sshll.u32 %s521_s15, 3 }
  0xb0   : > { %s3742_s13 = scalar_select %p3268_p4, 1, 0 }
  0xb1   : > { %s3743_s17 = scalar_select %p3272_p10, 1, 0 }
  0xb2   : > { %s2194_s26 = sshll.u32 %s2939_s24, 7  ;;  %s3744_s6 = sld [smem:[#allocation25_spill]] }
  0xb3   : > { %s525_s0 = scalar_lea.vmem [#allocation7], %s2193_s18  ;;  %p3286_p11 = pnand %p2529_p9, %p3255_p0 }
  0xb4   : > { %s532_s16 = sshll.u32 %s525_s0, 4  ;;  %s522_s2 = scalar_lea.sflag [#allocation8], %s521_s15  ;;  %s3282_s16 = int_to_ptr.vmem [resolvable:$true] %s532_s16 }
  0xb5   : > { %p2829_p8 = pneg %p3286_p11 }
  0xb8   : > { %s3280_s10 = scalar_lea.hbm %s3744_s6, %s2194_s26  ;;  %s2832_s11 = scalar_lea.hbm %s3744_s6, 256 }
  0xb9   : > { %s2827_s4 = scalar_lea.hbm %s3280_s10, 128  ;;  %p2833_p13 = scmp.lt.u32.totalorder %s3280_s10, %s3744_s6 }
  0xba   : > { %p2828_p12 = scmp.ne.s32.totalorder %s3280_s10, %s2827_s4  ;;  %p2834_p0 = scmp.lt.u32.totalorder %s2832_s11, %s2827_s4 }
  0xbb   : > { %p2836_p5 = scmp.lt.u32.totalorder %s2827_s4, %s3280_s10 }
  0xbc   : > { %p2830_p1 = pnand %p2829_p8, %p2828_p12  ;;  %p2835_p2 = por %p2834_p0, %p2833_p13 }
  0xbe   : > { %p2831_p3 = pneg %p2830_p1  ;;  %p2837_p7 = por %p2836_p5, %p2835_p2 }
  0xc0   : > { %p2838_p9 = pnand %p2837_p7, %p2831_p3 }
  0xc2   : > { %2841 = shalt.err (!%p2838_p9)
}
  0xc3   : > { %s2842_s15 = scalar_lea.vmem %s3282_s16, 128  ;;  %s2955_s0 = smov [#allocation7]  }
  0xc4   : > { %p2843_p12 = scmp.ne.s32.totalorder %s3282_s16, %s2842_s15  ;;  %s2847_s18 = sshll.u32 %s2955_s0, 4  ;;  %s2848_s18 = int_to_ptr.vmem [resolvable:$false] %s2847_s18 }
  0xc5   : > { %s2849_s26 = scalar_lea.vmem %s2848_s18, 256  ;;  %p2850_p4 = scmp.lt.s32.totalorder %s3282_s16, %s2848_s18 }
  0xc6   : > { %p2845_p1 = pnand %p2843_p12, %p2829_p8  ;;  %p2851_p13 = scmp.lt.s32.totalorder %s2849_s26, %s2842_s15 }
  0xc8   : > { %p2846_p10 = pneg %p2845_p1  ;;  %p2852_p0 = por %p2851_p13, %p2850_p4 }
  0xca   : > { %p2853_p2 = pnand %p2852_p0, %p2846_p10 }
  0xcc   : > { %2856 = shalt.err (!%p2853_p2)
}
  0xcd   : > { %2518 = dma.hbm_to_vmem [thread:$0]  (!%p3286_p11), %s3280_s10, 128, %s3282_s16, %s522_s2  }
  0xce   : > { %p3746_p3 = scmp.ne.s32.totalorder %s3734_s28, 0 }
  0xcf   : > { %s3318_s4 = sand.u32 (!%p3746_p3), 1, %s2931_s22  }
  0xd0   : > { %541 = sbr.rel (%p3746_p3) target bundleno = 3613 (0xe1d), region = 84  ;;  %s2196_s11 = sshll.u32 (!%p3746_p3), %s3318_s4, 3 }
  0xd1   : > { %s544_s25 = scalar_lea.sflag (!%p3746_p3), [#allocation8], %s3318_s4  ;;  %s547_s12 = scalar_lea.vmem (!%p3746_p3), [#allocation7], %s2196_s11 }
  0xd7   : > { %2906 = dma.done.wait (%p3261_p6), %s544_s25, 128  }
  0xd8   : > { %2908 = vsyncadd (%p3261_p6), %s544_s25, 4294967168  ;;  %p3747_p4 = scmp.eq.s32.totalorder %s3069_s27, 0 }
  0xda   : > { %2910 = dma.done.wait (%p3747_p4), [#allocation11], 1536   ;;  %p3748_p10 = pmov %p3747_p4 }
  0xdb   : > { %p3749_p11 = pmov %p3747_p4 }
  0xdc   : > { %2912 = vsyncadd (%p3748_p10), [#allocation11], 4294965760 }
  0xdd   : > { %2914 = dma.done.wait (%p3749_p11), [#allocation14], 528   ;;  %p3750_p8 = pmov %p3747_p4 }
  0xde   : > { %p3751_p5 = pmov %p3747_p4 }
  0xdf   : > { %2916 = vsyncadd (%p3750_p8), [#allocation14], 4294966768 }
  0xe0   : > { %2918 = dma.done.wait (%p3751_p5), [#allocation17], 528   ;;  %p3752_p7 = pmov %p3747_p4 }
  0xe1   : > { %v621_v0 = vld [vmem:[%s547_s12] sm:$0xff]  ;;  %vm623_vm0 = vcmask 523264   ;;  %v641_v3 = vlaneseq  ;;  %v2956_v5 = vmov 0.0   ;;  %s3405_s30 = scalar_lea.vmem [#allocation19], %s2196_s11  ;;  %s3407_s10 = smov 0  }
  0xe2   : > { %2920 = vsyncadd (%p3752_p7), [#allocation17], 4294966768  ;;  %v622_v1 = vmul.f32 %v621_v0, %v621_v0  ;;  %v2204_v26 = vld [vmem:[%s3702_s1] ss:$0 sm:$0xff] }
  0xe3   : > { %v3342_v4 = vand.u32 127, %v641_v3 }
  0xe4   : > { %v624_v2 = vsel %vm623_vm0, %v622_v1, 0.0 }
  0xe5   : > { %625 = vadd.xlane.f32.xlu0 %v624_v2  ;;  %vm649_vm1 = vcmp.ge.s32.totalorder %v3342_v4, 8  ;;  %vm650_vm2 = vcmp.lt.s32.totalorder %v3342_v4, 16  ;;  %vm655_vm3 = vcmp.ge.s32.totalorder %v3342_v4, 16  ;;  %vm656_vm4 = vcmp.lt.s32.totalorder %v3342_v4, 24 }
  0xe6   : > { %vm644_vm5 = vcmp.lt.s32.totalorder %v3342_v4, 8  ;;  %vm651_vm6 = vmand %vm649_vm1, %vm650_vm2  ;;  %vm661_vm7 = vcmp.ge.s32.totalorder %v3342_v4, 24  ;;  %vm662_vm8 = vcmp.lt.s32.totalorder %v3342_v4, 32  ;;  %vm667_vm10 = vcmp.ge.s32.totalorder %v3342_v4, 32 }
  0xe7   : > { %v3352_v6 = vsel %vm644_vm5, 1.0, %v2956_v5  ;;  %v3355_v7 = vsel %vm651_vm6, 1.0, %v2956_v5  ;;  %vm657_vm9 = vmand %vm655_vm3, %vm656_vm4  ;;  %vm668_vm11 = vcmp.lt.s32.totalorder %v3342_v4, 40  ;;  %vm673_vm13 = vcmp.ge.s32.totalorder %v3342_v4, 40 }
  0xe8   : > { %v648_v8 = vpack.c.bf16 %v3352_v6, %v3352_v6  ;;  %v654_v9 = vpack.c.bf16 %v3355_v7, %v3355_v7  ;;  %v3364_v10 = vsel %vm657_vm9, 1.0, %v2956_v5  ;;  %vm663_vm12 = vmand %vm661_vm7, %vm662_vm8  ;;  %vm674_vm15 = vcmp.lt.s32.totalorder %v3342_v4, 48 }
  0xe9   : > { %v660_v11 = vpack.c.bf16 %v3364_v10, %v3364_v10  ;;  %v3370_v12 = vsel %vm663_vm12, 1.0, %v2956_v5  ;;  %vm669_vm14 = vmand %vm667_vm10, %vm668_vm11  ;;  %vm679_vm1 = vcmp.ge.s32.totalorder %v3342_v4, 48  ;;  %vm680_vm3 = vcmp.lt.s32.totalorder %v3342_v4, 56 }
  0xea   : > { %v666_v13 = vpack.c.bf16 %v3370_v12, %v3370_v12  ;;  %v3377_v14 = vsel %vm669_vm14, 1.0, %v2956_v5  ;;  %vm675_vm2 = vmand %vm673_vm13, %vm674_vm15  ;;  %vm685_vm4 = vcmp.ge.s32.totalorder %v3342_v4, 56  ;;  %vm686_vm6 = vcmp.lt.s32.totalorder %v3342_v4, 64 }
  0xeb   : > { %v672_v15 = vpack.c.bf16 %v3377_v14, %v3377_v14  ;;  %v3384_v16 = vsel %vm675_vm2, 1.0, %v2956_v5  ;;  %vm681_vm5 = vmand %vm679_vm1, %vm680_vm3 }
  0xec   : > { %v678_v17 = vpack.c.bf16 %v3384_v16, %v3384_v16  ;;  %v3390_v18 = vsel %vm681_vm5, 1.0, %v2956_v5  ;;  %vm687_vm7 = vmand %vm685_vm4, %vm686_vm6 }
  0xed   : > { %v684_v19 = vpack.c.bf16 %v3390_v18, %v3390_v18  ;;  %v3395_v20 = vsel %vm687_vm7, 1.0, %v2956_v5 }
  0xee   : > { %v690_v21 = vpack.c.bf16 %v3395_v20, %v3395_v20 }
 0x172   : > { %v626_v22 = vpop.xlane.xlu0 %625 }
 0x173   : > { %v628_v23 = vmul.f32 0.015625, %v626_v22 }
 0x175   : > { %v629_v24 = vadd.f32 1e-05, %v628_v23 }
 0x177   : > { %2593 = vrsqrt.f32 %v629_v24 }
 0x181   : > { %v2594_v25 = vpop.eup %2593 }
 0x182   : > { %v631_v27 = vmul.f32 %v2594_v25, %v621_v0 }
 0x184   : > { %v639_v28 = vmul.f32 %v2204_v26, %v631_v27 }
 0x186   : > { %640 = vst.msk [vmem:[#allocation2] sm:$0xff] %vm623_vm0, %v639_v28 }
 0x187 LB: >> { %v2595_v29 = vld [vmem:[#allocation10 + $0x4] ss:$8 sps:$4 sm:$0xff]   ;;  %v2597_v30 = vld [vmem:[#allocation10] ss:$8 sps:$4 sm:$0xff]   ;;  %v2957_v31 = vmov 0   ;;  %v2958_v40 = vmov 0.0   ;;  %s2943_s10 = sphi %s3407_s10, %s696_s10  }
 0x188   : >> { %794 = vmatprep.mubr.bf16.mxu0 %v2957_v31  ;;  %762 = vmatprep.subr.bf16.mxu0 %v2595_v29  ;;  %v2598_v32 = vld [vmem:[#allocation10 + $0x14] ss:$8 sps:$4 sm:$0xff]   ;;  %v2600_v33 = vld [vmem:[#allocation10 + $0x10] ss:$8 sps:$4 sm:$0xff]   ;;  %v2601_v34 = vld [vmem:[#allocation10 + $0x24] ss:$8 sps:$4 sm:$0xff]  }
 0x189   : >> { %763 = vmatpush1.bf16.msra.mxu0 %v2597_v30  ;;  %v2603_v35 = vld [vmem:[#allocation10 + $0x20] ss:$8 sps:$4 sm:$0xff]   ;;  %v2604_v36 = vld [vmem:[#allocation10 + $0x34] ss:$8 sps:$4 sm:$0xff]   ;;  %v2606_v37 = vld [vmem:[#allocation10 + $0x30] ss:$8 sps:$4 sm:$0xff]   ;;  %2324 = vmatprep.subr.bf16.mxu1 %v2958_v40 }
 0x18a   : >> { %764 = vmatprep.subr.bf16.mxu0 %v2598_v32  ;;  %v3420_v41 = vshrl.u32 %v641_v3, 7  ;;  %v707_v43 = vld [vmem:[%s3704_s3] sm:$0x3]  ;;  %vm804_vm8 = vcmask 519168   ;;  %vm2959_vm9 = vmmov 0   ;;  %s2960_s15 = smov 64  }
 0x18b   : >> { %2326 = vmatprep.mubr.msk.bf16.mxu1 %vm2959_vm9, %v2958_v40  ;;  %vm887_vm10 = vcmask 1043456   ;;  %vm871_vm12 = vcmask 64512   ;;  %s3753_s25 = sld [smem:[#allocation29_spill]]  ;;  %s3754_s19 = sld [smem:[#allocation28_spill]] }
 0x18c   : >> { %v711_v42 = vsub.s32 0, %v3420_v41  ;;  %v715_v44 = vsub.s32 1, %v3420_v41  ;;  %vm822_vm11 = vcmp.gt.s32.totalorder %v3342_v4, %v3420_v41  ;;  %s3755_s2 = sld [smem:[#allocation30_spill]]  ;;  %s3757_s18 = sld [smem:[#allocation32_spill]] }
 0x18d   : >> { %765 = vmatpush1.bf16.msra.mxu0 %v2600_v33  ;;  %v3412_v38 = vld [vmem:[#allocation2] sm:$0xff]  ;;  %v3506_v23 = vsel %vm822_vm11, -1e+30, %v2958_v40  ;;  %s696_s10 = sadd.s32 1, %s2943_s10  }
 0x18e   : >> { %766 = vmatprep.subr.bf16.mxu0 %v2601_v34  ;;  %v698_v39 = vpack.c.bf16 %v3412_v38, %v3412_v38  ;;  %v712_v45 = vrot.slane %v707_v43, %v711_v42  ;;  %v716_v46 = vrot.slane %v707_v43, %v715_v44  ;;  %p693_p6 = scmp.ge.s32.totalorder %s696_s10, 4  }
 0x18f   : > { %vm2961_vm13 = vmmov (%p693_p6), 0   ;;  %s3758_s11 = sld [smem:[#allocation33_spill]] (%p693_p6)  ;;  %s2268_s12 = sshll.u32 (%p693_p6), %s3069_s27, 7 }
 0x190   : > { %s2039_s0 = scalar_lea.sflag (%p693_p6), [#allocation9], %s3318_s4  ;;  %p3760_p12 = scmp.ne.s32.totalorder (%p693_p6), %s3742_s13, 0 }
 0x191   : >> { %767 = vmatpush1.bf16.msra.mxu0 %v2603_v35  ;;  %s2962_s27 = smov (%p693_p6), [#allocation19]  }
 0x192   : >> { %768 = vmatprep.subr.bf16.mxu0 %v2604_v36  ;;  %s2861_s10 = sshll.u32 (%p693_p6), %s2962_s27, 4  ;;  %s2862_s10 = int_to_ptr.vmem [resolvable:$false] %s2861_s10 }
 0x193   : > { %s2863_s26 = scalar_lea.vmem (%p693_p6), %s2862_s10, 256 }
 0x195   : >> { %769 = vmatpush1.bf16.msra.mxu0 %v2606_v37  ;;  %v2261_v4 = vld [vmem:[%s3758_s11] ss:$0 sm:$0xff] (%p693_p6) }
 0x196   : >> { %2348 = vmatprep.subr.bf16.mxu0 %v2958_v40 }
 0x198   : >> { %2221 = vmatmul.mubr.msk.bf16.vlgmr.msra.gmra.mrb[0].mxu0 %vm623_vm0, %v698_v39 }
 0x199   : >> { %2350 = vmatprep.mubr.msk.bf16.mxu0 %vm2959_vm9, %v2958_v40 }
 0x26b   : >> { %v796_v47 = vpop.f32.mrb[0].mxu0 }
 0x26c   : >> { %v797_v48 = vadd.f32 %v796_v47, %v712_v45  ;;  %v798_v49 = vpop.f32.mrb[1].mxu0 }
 0x26d   : >> { %v799_v50 = vadd.f32 %v798_v49, %v716_v46  ;;  %v800_v51 = vpop.f32.mrb[2].mxu0 }
 0x26e   : >> { %v803_v52 = vpack.c.bf16 %v797_v48, %v797_v48  ;;  %v801_v53 = vpop.f32.mrb[3].mxu0 }
 0x26f   : >> { %v813_v54 = vpack.c.bf16 %v799_v50, %v799_v50 }
 0x270   : >> { %809 = vrot.lane.b32.xlu0 %v803_v52, %s2960_s15  ;;  %805 = vst.msk [vmem:[#allocation3] sm:$0xf] %vm804_vm8, %v803_v52 }
 0x271   : >> { %814 = vst.msk [vmem:[#allocation5] sm:$0xf] %vm804_vm8, %v813_v54 }
 0x277   : >> { %v3438_v58 = vld [vmem:[#allocation3] sm:$0xf] }
 0x278   : >> { %v816_v59 = vld [vmem:[#allocation5] sm:$0xf]  ;;  %v824_v60 = vmul.bf16 %v3438_v58, %v648_v8  ;;  %v1034_v61 = vmul.bf16 %v3438_v58, %v660_v11  ;;  %v1135_v63 = vmul.bf16 %v3438_v58, %v666_v13  ;;  %v1236_v0 = vmul.bf16 %v3438_v58, %v672_v15 }
 0x279   : >> { %v3450_v62 = vsel %vm887_vm10, %v816_v59, 0  ;;  %v1337_v1 = vmul.bf16 %v3438_v58, %v678_v17  ;;  %v1438_v2 = vmul.bf16 %v3438_v58, %v684_v19  ;;  %v1539_v22 = vmul.bf16 %v3438_v58, %v690_v21 }
 0x2e2   : >> { %v810_v55 = vpop.permute.xlu0 %809 }
 0x2e3   : >> { %812 = vst.msk [vmem:[#allocation4] sm:$0xf] %vm804_vm8, %v810_v55 }
 0x2ea   : >> { %v815_v56 = vld [vmem:[#allocation4] sm:$0xf] }
 0x2eb   : >> { %v3432_v57 = vsel %vm623_vm0, %v815_v56, 0 }
 0x2ec   : >> { %2325 = vmatpush3.bf16.xpose.msra.mxu1 %v3432_v57  ;;  %2349 = vmatpush3.bf16.xpose.msra.mxu0 %v3432_v57 }
 0x2ed   : >> { %2330 = vmatprep.subr.bf16.mxu1 %v2958_v40  ;;  %2360 = vmatprep.subr.bf16.mxu0 %v2958_v40 }
 0x2f3   : >> { %2327 = vmatmul.mubr.msk.bf16.vlgmr.msra.gmra.mrb[0].mxu1 %vm623_vm0, %v824_v60  ;;  %2351 = vmatmul.mubr.msk.bf16.vlgmr.msra.gmra.mrb[4].mxu0 %vm623_vm0, %v1034_v61 }
 0x2f4   : >> { %2331 = vmatpush3.bf16.msra.mxu1 %v3450_v62  ;;  %2361 = vmatpush3.bf16.xpose.msra.mxu0 %v3432_v57 }
 0x2f5   : >> { %2362 = vmatprep.mubr.msk.bf16.mxu0 %vm2959_vm9, %v2958_v40  ;;  %2372 = vmatprep.subr.bf16.mxu0 %v2958_v40 }
 0x2f6   : >> { %2332 = vmatprep.mubr.msk.bf16.mxu1 %vm2959_vm9, %v2958_v40  ;;  %2336 = vmatprep.subr.bf16.mxu1 %v2958_v40 }
 0x2fb   : >> { %2363 = vmatmul.mubr.msk.bf16.vlgmr.msra.gmra.mrb[8].mxu0 %vm623_vm0, %v1135_v63 }
 0x2fc   : >> { %2373 = vmatpush3.bf16.xpose.msra.mxu0 %v3432_v57  ;;  %2374 = vmatprep.mubr.msk.bf16.mxu0 %vm2959_vm9, %v2958_v40 }
 0x2fd   : >> { %2384 = vmatprep.subr.bf16.mxu0 %v2958_v40 }
 0x303   : >> { %2375 = vmatmul.mubr.msk.bf16.vlgmr.msra.gmra.mrb[12].mxu0 %vm623_vm0, %v1236_v0 }
 0x304   : >> { %2385 = vmatpush3.bf16.xpose.msra.mxu0 %v3432_v57  ;;  %2386 = vmatprep.mubr.msk.bf16.mxu0 %vm2959_vm9, %v2958_v40 }
 0x305   : >> { %2396 = vmatprep.subr.bf16.mxu0 %v2958_v40 }
 0x30b   : >> { %2387 = vmatmul.mubr.msk.bf16.vlgmr.msra.gmra.mrb[16].mxu0 %vm623_vm0, %v1337_v1 }
 0x30c   : >> { %2397 = vmatpush3.bf16.xpose.msra.mxu0 %v3432_v57  ;;  %2398 = vmatprep.mubr.msk.bf16.mxu0 %vm2959_vm9, %v2958_v40 }
 0x30d   : >> { %2408 = vmatprep.subr.bf16.mxu0 %v2958_v40 }
 0x313   : >> { %2399 = vmatmul.mubr.msk.bf16.vlgmr.msra.gmra.mrb[20].mxu0 %vm623_vm0, %v1438_v2 }
 0x314   : >> { %2409 = vmatpush3.bf16.xpose.msra.mxu0 %v3432_v57  ;;  %2410 = vmatprep.mubr.msk.bf16.mxu0 %vm2959_vm9, %v2958_v40 }
 0x315   : >> { %2420 = vmatprep.subr.bf16.mxu0 %v2958_v40 }
 0x31b   : >> { %2411 = vmatmul.mubr.msk.bf16.vlgmr.msra.gmra.mrb[24].mxu0 %vm623_vm0, %v1539_v22 }
 0x31c   : >> { %2428 = vmatprep.mubr.msk.bf16.mxu0 %vm2959_vm9, %v2958_v40 }
 0x3c6   : >> { %v865_v24 = vpop.f32.mrb[0].mxu1  ;;  %v1072_v25 = vpop.f32.mrb[4].mxu0 }
 0x3c7   : >> { %v866_v26 = vadd.f32 %v865_v24, %v3506_v23  ;;  %v2328_v27 = vpop.f32.mrb[1].mxu1  ;;  %v2352_v28 = vpop.f32.mrb[5].mxu0  ;;  %v933_v24 = vmul.bf16 %v3438_v58, %v654_v9  ;;  %v1073_v58 = vadd.f32 %v1072_v25, %v3506_v23 }
 0x3c8   : >> { %v868_v29 = vpop.f32.mrb[2].mxu1  ;;  %v1075_v30 = vpop.f32.mrb[6].mxu0 }
 0x3c9   : >> { %v2329_v31 = vpop.f32.mrb[3].mxu1  ;;  %v2353_v32 = vpop.f32.mrb[7].mxu0  ;;  %v872_v33 = vsel %vm871_vm12, %v866_v26, -inf }
 0x3ca   : >> { %873 = vmax.xlane.f32.xlu0 %v872_v33 }
 0x3ce   : >> { %v1173_v34 = vpop.f32.mrb[8].mxu0 }
 0x3cf   : >> { %v2364_v35 = vpop.f32.mrb[9].mxu0 }
 0x3d0   : >> { %v1176_v36 = vpop.f32.mrb[10].mxu0 }
 0x3d1   : >> { %v2365_v37 = vpop.f32.mrb[11].mxu0  ;;  %v1174_v36 = vadd.f32 %v1173_v34, %v3506_v23 }
 0x3d2   : >> { %v1078_v37 = vsel %vm871_vm12, %v1073_v58, -inf }
 0x3d6   : >> { %v1274_v39 = vpop.f32.mrb[12].mxu0 }
 0x3d7   : >> { %v2376_v41 = vpop.f32.mrb[13].mxu0 }
 0x3d8   : >> { %v1277_v42 = vpop.f32.mrb[14].mxu0  ;;  %v1275_v41 = vadd.f32 %v1274_v39, %v3506_v23 }
 0x3d9   : >> { %v2377_v43 = vpop.f32.mrb[15].mxu0  ;;  %v1179_v42 = vsel %vm871_vm12, %v1174_v36, -inf }
 0x3de   : >> { %v1375_v44 = vpop.f32.mrb[16].mxu0 }
 0x3df   : >> { %v2388_v45 = vpop.f32.mrb[17].mxu0  ;;  %v1376_v43 = vadd.f32 %v1375_v44, %v3506_v23 }
 0x3e0   : >> { %v1378_v46 = vpop.f32.mrb[18].mxu0  ;;  %v1280_v45 = vsel %vm871_vm12, %v1275_v41, -inf }
 0x3e1   : >> { %v2389_v47 = vpop.f32.mrb[19].mxu0  ;;  %v1381_v46 = vsel %vm871_vm12, %v1376_v43, -inf }
 0x3e6   : >> { %v1476_v48 = vpop.f32.mrb[20].mxu0 }
 0x3e7   : >> { %v2400_v49 = vpop.f32.mrb[21].mxu0  ;;  %v1477_v25 = vadd.f32 %v1476_v48, %v3506_v23 }
 0x3e8   : >> { %v1479_v50 = vpop.f32.mrb[22].mxu0 }
 0x3e9   : >> { %v2401_v51 = vpop.f32.mrb[23].mxu0  ;;  %v1482_v47 = vsel %vm871_vm12, %v1477_v25, -inf }
 0x3ee   : >> { %v1577_v52 = vpop.f32.mrb[24].mxu0 }
 0x3ef   : >> { %v2412_v53 = vpop.f32.mrb[25].mxu0  ;;  %v1578_v34 = vadd.f32 %v1577_v52, %v3506_v23 }
 0x3f0   : >> { %v1580_v54 = vpop.f32.mrb[26].mxu0 }
 0x3f1   : >> { %v2413_v55 = vpop.f32.mrb[27].mxu0  ;;  %v1583_v39 = vsel %vm871_vm12, %v1578_v34, -inf }
 0x457   : >> { %v874_v56 = vpop.xlane.xlu0 %873 }
 0x458   : >> { %v875_v59 = vsub.f32 %v866_v26, %v874_v56 }
 0x45a   : >> { %v876_v60 = vmul.f32 1.442695, %v875_v59 }
 0x45c   : >> { %2619 = vpow2.f32 %v876_v60 }
 0x466   : >> { %v2620_v61 = vpop.eup %2619 }
 0x467   : >> { %v878_v63 = vsel %vm871_vm12, %v2620_v61, 0.0 }
 0x468   : >> { %879 = vadd.xlane.f32.xlu1 %v878_v63 }
 0x4f5   : >> { %v880_v0 = vpop.xlane.xlu1 %879 }
 0x4f6   : >> { %2621 = vrcp.f32 %v880_v0 }
 0x500   : >> { %v2622_v1 = vpop.eup %2621 }
 0x501   : >> { %v882_v2 = vmul.f32 %v2622_v1, %v2620_v61 }
 0x503   : >> { %v883_v22 = vpack.c.bf16 %v882_v2, %v882_v2 }
 0x505   : >> { %2333 = vmatmul.mubr.msk.bf16.vlgmr.msra.gmra.mrb[4].mxu1 %vm871_vm12, %v883_v22 }
 0x506   : >> { %2337 = vmatpush3.bf16.xpose.msra.mxu1 %v3432_v57  ;;  %2338 = vmatprep.mubr.msk.bf16.mxu1 %vm2959_vm9, %v2958_v40 }
 0x507   : >> { %2342 = vmatprep.subr.bf16.mxu1 %v2958_v40 }
 0x50d   : >> { %2339 = vmatmul.mubr.msk.bf16.vlgmr.msra.gmra.mrb[8].mxu1 %vm623_vm0, %v933_v24 }
 0x50e   : >> { %2343 = vmatpush3.bf16.msra.mxu1 %v3450_v62  ;;  %2344 = vmatprep.mubr.msk.bf16.mxu1 %vm2959_vm9, %v2958_v40 }
 0x50f   : >> { %2354 = vmatprep.subr.bf16.mxu1 %v2958_v40 }
 0x5d8   : >> { %v3525_v57 = vpop.f32.mrb[4].mxu1 }
 0x5d9   : >> { %v2334_v26 = vpop.f32.mrb[5].mxu1 }
 0x5da   : >> { %v928_v27 = vpop.f32.mrb[6].mxu1 }
 0x5db   : >> { %v2335_v28 = vpop.f32.mrb[7].mxu1 }
 0x5e0   : >> { %v971_v29 = vpop.f32.mrb[8].mxu1 }
 0x5e1   : >> { %v972_v30 = vadd.f32 %v971_v29, %v3506_v23  ;;  %v2340_v31 = vpop.f32.mrb[9].mxu1 }
 0x5e2   : >> { %v974_v32 = vpop.f32.mrb[10].mxu1 }
 0x5e3   : >> { %v2341_v33 = vpop.f32.mrb[11].mxu1  ;;  %v977_v35 = vsel %vm871_vm12, %v972_v30, -inf }
 0x5e4   : >> { %978 = vmax.xlane.f32.xlu1 %v977_v35 }
 0x5e8   : >> { %1079 = vmax.xlane.f32.xlu1 %v1078_v37 }
 0x5ec   : >> { %1180 = vmax.xlane.f32.xlu1 %v1179_v42 }
 0x5f0   : >> { %1281 = vmax.xlane.f32.xlu1 %v1280_v45 }
 0x5f4   : >> { %1382 = vmax.xlane.f32.xlu1 %v1381_v46 }
 0x5f8   : >> { %1483 = vmax.xlane.f32.xlu1 %v1482_v47 }
 0x5fc   : >> { %1584 = vmax.xlane.f32.xlu1 %v1583_v39 }
 0x671   : >> { %v979_v49 = vpop.xlane.xlu1 %978 }
 0x672   : >> { %v980_v50 = vsub.f32 %v972_v30, %v979_v49 }
 0x674   : >> { %v981_v51 = vmul.f32 1.442695, %v980_v50 }
 0x675   : >> { %v1080_v44 = vpop.xlane.xlu1 %1079 }
 0x676   : >> { %2623 = vpow2.f32 %v981_v51  ;;  %v1081_v53 = vsub.f32 %v1073_v58, %v1080_v44 }
 0x678   : >> { %v1082_v54 = vmul.f32 1.442695, %v1081_v53 }
 0x679   : >> { %v1181_v55 = vpop.xlane.xlu1 %1180 }
 0x67a   : >> { %2625 = vpow2.f32 %v1082_v54  ;;  %v1182_v48 = vsub.f32 %v1174_v36, %v1181_v55 }
 0x67c   : >> { %v1183_v56 = vmul.f32 1.442695, %v1182_v48 }
 0x67d   : >> { %v1282_v59 = vpop.xlane.xlu1 %1281 }
 0x67e   : >> { %2627 = vpow2.f32 %v1183_v56  ;;  %v1283_v23 = vsub.f32 %v1275_v41, %v1282_v59 }
 0x680   : >> { %v2624_v52 = vpop.eup %2623  ;;  %v1284_v60 = vmul.f32 1.442695, %v1283_v23 }
 0x681   : >> { %v1383_v61 = vpop.xlane.xlu1 %1382  ;;  %v983_v63 = vsel %vm871_vm12, %v2624_v52, 0.0 }
 0x682   : >> { %2629 = vpow2.f32 %v1284_v60  ;;  %v1384_v0 = vsub.f32 %v1376_v43, %v1383_v61  ;;  %984 = vadd.xlane.f32.xlu1 %v983_v63 }
 0x684   : >> { %v2626_v1 = vpop.eup %2625  ;;  %v1385_v2 = vmul.f32 1.442695, %v1384_v0 }
 0x685   : >> { %v1484_v22 = vpop.xlane.xlu1 %1483  ;;  %v1084_v24 = vsel %vm871_vm12, %v2626_v1, 0.0 }
 0x686   : >> { %2631 = vpow2.f32 %v1385_v2  ;;  %v1485_v26 = vsub.f32 %v1477_v25, %v1484_v22  ;;  %1085 = vadd.xlane.f32.xlu0 %v1084_v24 }
 0x688   : >> { %v2628_v27 = vpop.eup %2627  ;;  %v1486_v28 = vmul.f32 1.442695, %v1485_v26 }
 0x689   : >> { %v1585_v29 = vpop.xlane.xlu1 %1584  ;;  %v1185_v30 = vsel %vm871_vm12, %v2628_v27, 0.0 }
 0x68a   : >> { %2633 = vpow2.f32 %v1486_v28  ;;  %v1586_v31 = vsub.f32 %v1578_v34, %v1585_v29  ;;  %1186 = vadd.xlane.f32.xlu1 %v1185_v30  ;;  %v2607_v28 = vld [vmem:[#allocation12] sm:$0xff]   ;;  %v2608_v29 = vld [vmem:[#allocation12 + $0x8] sm:$0xff]   ;;  %v2609_v30 = vld [vmem:[#allocation12 + $0x10] sm:$0xff]  }
 0x68b   : >> { %2421 = vmatpush3.bf16.msra.mxu0 %v2607_v28 }
 0x68c   : >> { %v2630_v32 = vpop.eup %2629  ;;  %v1587_v58 = vmul.f32 1.442695, %v1586_v31  ;;  %2422 = vmatprep.subr.bf16.mxu0 %v2958_v40 }
 0x68d   : >> { %v1286_v33 = vsel %vm871_vm12, %v2630_v32, 0.0 }
 0x68e   : >> { %2635 = vpow2.f32 %v1587_v58  ;;  %1287 = vadd.xlane.f32.xlu0 %v1286_v33 }
 0x68f   : >> { %2423 = vmatpush3.bf16.msra.mxu0 %v2608_v29 }
 0x690   : >> { %v2632_v35 = vpop.eup %2631  ;;  %2424 = vmatprep.subr.bf16.mxu0 %v2958_v40 }
 0x691   : >> { %v1387_v36 = vsel %vm871_vm12, %v2632_v35, 0.0 }
 0x692   : >> { %1388 = vadd.xlane.f32.xlu1 %v1387_v36 }
 0x693   : >> { %2425 = vmatpush3.bf16.msra.mxu0 %v2609_v30 }
 0x694   : >> { %v2634_v37 = vpop.eup %2633  ;;  %2426 = vmatprep.subr.bf16.mxu0 %v2958_v40 }
 0x695   : >> { %v1488_v41 = vsel %vm871_vm12, %v2634_v37, 0.0 }
 0x696   : >> { %1489 = vadd.xlane.f32.xlu0 %v1488_v41 }
 0x698   : >> { %v2636_v42 = vpop.eup %2635 }
 0x699   : >> { %v1589_v43 = vsel %vm871_vm12, %v2636_v42, 0.0 }
 0x69a   : >> { %1590 = vadd.xlane.f32.xlu1 %v1589_v43 }
 0x70f   : >> { %v985_v45 = vpop.xlane.xlu1 %984 }
 0x710   : >> { %2637 = vrcp.f32 %v985_v45 }
 0x713   : >> { %v1086_v25 = vpop.xlane.xlu0 %1085 }
 0x714   : >> { %2639 = vrcp.f32 %v1086_v25 }
 0x717   : >> { %v1187_v46 = vpop.xlane.xlu1 %1186 }
 0x718   : >> { %2641 = vrcp.f32 %v1187_v46 }
 0x71a   : >> { %v2638_v34 = vpop.eup %2637 }
 0x71b   : >> { %v987_v47 = vmul.f32 %v2638_v34, %v2624_v52  ;;  %v1288_v51 = vpop.xlane.xlu0 %1287 }
 0x71c   : >> { %2643 = vrcp.f32 %v1288_v51 }
 0x71d   : >> { %v988_v39 = vpack.c.bf16 %v987_v47, %v987_v47 }
 0x71e   : >> { %v2640_v49 = vpop.eup %2639 }
 0x71f   : >> { %2345 = vmatmul.mubr.msk.bf16.vlgmr.msra.gmra.mrb[12].mxu1 %vm871_vm12, %v988_v39  ;;  %v1088_v50 = vmul.f32 %v2640_v49, %v2626_v1  ;;  %v1389_v55 = vpop.xlane.xlu1 %1388 }
 0x720   : >> { %2355 = vmatpush3.bf16.msra.mxu1 %v3450_v62  ;;  %2356 = vmatprep.mubr.msk.bf16.mxu1 %vm2959_vm9, %v2958_v40  ;;  %2645 = vrcp.f32 %v1389_v55 }
 0x721   : >> { %2366 = vmatprep.subr.bf16.mxu1 %v2958_v40  ;;  %v1089_v44 = vpack.c.bf16 %v1088_v50, %v1088_v50 }
 0x722   : >> { %v2642_v53 = vpop.eup %2641 }
 0x723   : >> { %v1189_v54 = vmul.f32 %v2642_v53, %v2628_v27  ;;  %v1490_v23 = vpop.xlane.xlu0 %1489 }
 0x724   : >> { %2647 = vrcp.f32 %v1490_v23 }
 0x725   : >> { %v1190_v48 = vpack.c.bf16 %v1189_v54, %v1189_v54 }
 0x726   : >> { %v2644_v56 = vpop.eup %2643 }
 0x727   : >> { %2357 = vmatmul.mubr.msk.bf16.vlgmr.msra.gmra.mrb[16].mxu1 %vm871_vm12, %v1089_v44  ;;  %v1290_v59 = vmul.f32 %v2644_v56, %v2630_v32  ;;  %v1591_v63 = vpop.xlane.xlu1 %1590  ;;  %v931_v32 = vmul.f32 %v3352_v6, %v3525_v57 }
 0x728   : >> { %2367 = vmatpush3.bf16.msra.mxu1 %v3450_v62  ;;  %2368 = vmatprep.mubr.msk.bf16.mxu1 %vm2959_vm9, %v2958_v40  ;;  %2649 = vrcp.f32 %v1591_v63 }
 0x729   : >> { %2378 = vmatprep.subr.bf16.mxu1 %v2958_v40  ;;  %v1291_v52 = vpack.c.bf16 %v1290_v59, %v1290_v59 }
 0x72a   : >> { %v2646_v60 = vpop.eup %2645 }
 0x72b   : >> { %v1391_v61 = vmul.f32 %v2646_v60, %v2632_v35 }
 0x72d   : >> { %v1392_v0 = vpack.c.bf16 %v1391_v61, %v1391_v61 }
 0x72e   : >> { %v2648_v1 = vpop.eup %2647 }
 0x72f   : >> { %2369 = vmatmul.mubr.msk.bf16.vlgmr.msra.gmra.mrb[20].mxu1 %vm871_vm12, %v1190_v48  ;;  %v1492_v2 = vmul.f32 %v2648_v1, %v2634_v37 }
 0x730   : >> { %2379 = vmatpush3.bf16.msra.mxu1 %v3450_v62  ;;  %2380 = vmatprep.mubr.msk.bf16.mxu1 %vm2959_vm9, %v2958_v40 }
 0x731   : >> { %2390 = vmatprep.subr.bf16.mxu1 %v2958_v40  ;;  %v1493_v22 = vpack.c.bf16 %v1492_v2, %v1492_v2 }
 0x732   : >> { %v2650_v24 = vpop.eup %2649 }
 0x733   : >> { %v1593_v26 = vmul.f32 %v2650_v24, %v2636_v42 }
 0x735   : >> { %v1594_v27 = vpack.c.bf16 %v1593_v26, %v1593_v26 }
 0x737   : >> { %2381 = vmatmul.mubr.msk.bf16.vlgmr.msra.gmra.mrb[24].mxu1 %vm871_vm12, %v1291_v52 }
 0x738   : >> { %2391 = vmatpush3.bf16.msra.mxu1 %v3450_v62  ;;  %2392 = vmatprep.mubr.msk.bf16.mxu1 %vm2959_vm9, %v2958_v40 }
 0x739   : >> { %2402 = vmatprep.subr.bf16.mxu1 %v2958_v40 }
 0x73f   : >> { %2393 = vmatmul.mubr.msk.bf16.vlgmr.msra.gmra.mrb[28].mxu1 %vm871_vm12, %v1392_v0 }
 0x740   : >> { %2403 = vmatpush3.bf16.msra.mxu1 %v3450_v62  ;;  %2404 = vmatprep.mubr.msk.bf16.mxu1 %vm2959_vm9, %v2958_v40 }
 0x741   : >> { %2414 = vmatprep.subr.bf16.mxu1 %v2958_v40 }
 0x747   : >> { %2405 = vmatmul.mubr.msk.bf16.vlgmr.msra.gmra.mrb[32].mxu1 %vm871_vm12, %v1493_v22 }
 0x748   : >> { %2415 = vmatpush3.bf16.msra.mxu1 %v3450_v62  ;;  %2416 = vmatprep.mubr.msk.bf16.mxu1 %vm2959_vm9, %v2958_v40  ;;  %v2610_v62 = vld [vmem:[#allocation12 + $0x18] sm:$0xff]  }
 0x749   : >> { %2432 = vmatprep.subr.bf16.mxu1 %v2958_v40  ;;  %2427 = vmatpush3.bf16.msra.mxu0 %v2610_v62 }
 0x74a   : >> { %2444 = vmatprep.subr.bf16.mxu0 %v2958_v40 }
 0x74f   : >> { %2417 = vmatmul.mubr.msk.bf16.vlgmr.msra.gmra.mrb[36].mxu1 %vm871_vm12, %v1594_v27 }
 0x750   : >> { %2440 = vmatprep.mubr.msk.bf16.mxu1 %vm2959_vm9, %v2958_v40 }
 0x7f2   : >> { %v1026_v31 = vpop.f32.mrb[12].mxu1 }
 0x7f3   : >> { %v1032_v58 = vmul.f32 %v3355_v7, %v1026_v31  ;;  %v2346_v33 = vpop.f32.mrb[13].mxu1 }
 0x7f4   : >> { %v1029_v35 = vpop.f32.mrb[14].mxu1 }
 0x7f5   : >> { %v1033_v36 = vadd.f32 %v1032_v58, %v931_v32  ;;  %v2347_v37 = vpop.f32.mrb[15].mxu1  ;;  %v2239_v58 = vld [vmem:[%s3706_s5] ss:$0 sm:$0xff] }
 0x7fa   : >> { %v1127_v41 = vpop.f32.mrb[16].mxu1 }
 0x7fb   : >> { %v1133_v42 = vmul.f32 %v3364_v10, %v1127_v41  ;;  %v2358_v43 = vpop.f32.mrb[17].mxu1 }
 0x7fc   : >> { %v1130_v45 = vpop.f32.mrb[18].mxu1 }
 0x7fd   : >> { %v1134_v25 = vadd.f32 %v1133_v42, %v1033_v36  ;;  %v2359_v46 = vpop.f32.mrb[19].mxu1 }
 0x802   : >> { %v1228_v34 = vpop.f32.mrb[20].mxu1 }
 0x803   : >> { %v1234_v47 = vmul.f32 %v3370_v12, %v1228_v34  ;;  %v2370_v39 = vpop.f32.mrb[21].mxu1 }
 0x804   : >> { %v1231_v49 = vpop.f32.mrb[22].mxu1  ;;  %v2611_v39 = vld [vmem:[#allocation15] sm:$0xff]  }
 0x805   : >> { %v1235_v50 = vadd.f32 %v1234_v47, %v1134_v25  ;;  %v2371_v57 = vpop.f32.mrb[23].mxu1  ;;  %2433 = vmatpush3.bf16.msra.mxu1 %v2611_v39  ;;  %v2612_v49 = vld [vmem:[#allocation15 + $0x8] sm:$0xff]   ;;  %v2260_v39 = vld [vmem:[%s3757_s18] ss:$0 sm:$0xff] }
 0x806   : >> { %2434 = vmatprep.subr.bf16.mxu1 %v2958_v40  ;;  %v2615_v57 = vld [vmem:[%s3753_s25] sm:$0xff]  }
 0x809   : >> { %2435 = vmatpush3.bf16.msra.mxu1 %v2612_v49 }
 0x80a   : >> { %v1329_v51 = vpop.f32.mrb[24].mxu1  ;;  %2436 = vmatprep.subr.bf16.mxu1 %v2958_v40 }
 0x80b   : >> { %v1335_v44 = vmul.f32 %v3377_v14, %v1329_v51  ;;  %v2382_v53 = vpop.f32.mrb[25].mxu1  ;;  %v2616_v51 = vld [vmem:[%s3753_s25 + $0x8] sm:$0xff]  }
 0x80c   : >> { %v1332_v54 = vpop.f32.mrb[26].mxu1 }
 0x80d   : >> { %v1336_v55 = vadd.f32 %v1335_v44, %v1235_v50  ;;  %v2383_v48 = vpop.f32.mrb[27].mxu1  ;;  %v2613_v50 = vld [vmem:[#allocation15 + $0x10] sm:$0xff]  }
 0x80e   : >> { %2437 = vmatpush3.bf16.msra.mxu1 %v2613_v50  ;;  %v2245_v48 = vld [vmem:[%s3754_s19] ss:$0 sm:$0xff]  ;;  %s3756_s19 = sld [smem:[#allocation31_spill]] }
 0x80f   : >> { %2438 = vmatprep.subr.bf16.mxu1 %v2958_v40 }
 0x812   : >> { %v1430_v56 = vpop.f32.mrb[28].mxu1 }
 0x813   : >> { %v1436_v59 = vmul.f32 %v3384_v16, %v1430_v56  ;;  %v2394_v23 = vpop.f32.mrb[29].mxu1 }
 0x814   : >> { %v1433_v52 = vpop.f32.mrb[30].mxu1 }
 0x815   : >> { %v1437_v60 = vadd.f32 %v1436_v59, %v1336_v55  ;;  %v2395_v61 = vpop.f32.mrb[31].mxu1  ;;  %v2246_v59 = vld [vmem:[#allocation13] ss:$0 sm:$0xff] }
 0x816   : >> { %v2617_v61 = vld [vmem:[%s3753_s25 + $0x10] sm:$0xff]  }
 0x81a   : >> { %v1531_v63 = vpop.f32.mrb[32].mxu1 }
 0x81b   : >> { %v1537_v0 = vmul.f32 %v3390_v18, %v1531_v63  ;;  %v2406_v1 = vpop.f32.mrb[33].mxu1  ;;  %v2618_v63 = vld [vmem:[%s3753_s25 + $0x18] sm:$0xff]  }
 0x81c   : >> { %v1534_v2 = vpop.f32.mrb[34].mxu1 }
 0x81d   : >> { %v1538_v22 = vadd.f32 %v1537_v0, %v1437_v60  ;;  %v2407_v24 = vpop.f32.mrb[35].mxu1  ;;  %v2247_v0 = vld [vmem:[#allocation16] ss:$0 sm:$0xff] }
 0x822   : >> { %v1632_v26 = vpop.f32.mrb[36].mxu1 }
 0x823   : >> { %v1638_v27 = vmul.f32 %v3395_v20, %v1632_v26  ;;  %v2418_v28 = vpop.f32.mrb[37].mxu1 }
 0x824   : >> { %v1635_v29 = vpop.f32.mrb[38].mxu1 }
 0x825   : >> { %v1639_v30 = vadd.f32 %v1638_v27, %v1538_v22  ;;  %v2419_v62 = vpop.f32.mrb[39].mxu1  ;;  %v2253_v29 = vld [vmem:[%s3755_s2] ss:$0 sm:$0xff]  ;;  %s2052_s2 = sshll.u32 (%p693_p6), %s3405_s30, 4  ;;  %s3658_s2 = int_to_ptr.vmem [resolvable:$true] %s2052_s2 }
 0x826   : > { %s2857_s18 = scalar_lea.vmem (%p693_p6), %s3658_s2, 128  ;;  %p2864_p0 = scmp.lt.s32.totalorder (%p693_p6), %s3658_s2, %s2862_s10 }
 0x827   : >> { %1640 = vst.msk [vmem:[#allocation6] sm:$0xff] %vm623_vm0, %v1639_v30  ;;  %p2858_p9 = scmp.ne.s32.totalorder (%p693_p6), %s3658_s2, %s2857_s18  ;;  %p2865_p2 = scmp.lt.s32.totalorder (%p693_p6), %s2863_s26, %s2857_s18 }
 0x829   : > { %p2859_p1 = pnand (%p693_p6), %p2858_p9, %p3760_p12  ;;  %p2866_p3 = por (%p693_p6), %p2865_p2, %p2864_p0 }
 0x82b   : > { %p2860_p13 = pneg (%p693_p6), %p2859_p1 }
 0x82d   : > { %p2867_p4 = pnand (%p693_p6), %p2866_p3, %p2860_p13 }
 0x82e   : >> { %v1641_v31 = vld [vmem:[#allocation6] sm:$0xff] }
 0x82f   : >> { %v1642_v32 = vpack.c.bf16 %v1641_v31, %v1641_v31 }
 0x831   : >> { %2429 = vmatmul.mubr.msk.bf16.vlgmr.msra.gmra.mrb[28].mxu0 %vm623_vm0, %v1642_v32 }
 0x832   : >> { %2452 = vmatprep.mubr.msk.bf16.mxu0 %vm2959_vm9, %v2958_v40  ;;  %2445 = vmatpush3.bf16.msra.mxu0 %v2615_v57  ;;  %v2656_v57 = vld [vmem:[#allocation18 + $0x8] sm:$0xff] (%p693_p6)  }
 0x833   : >> { %2446 = vmatprep.subr.bf16.mxu0 %v2958_v40 }
 0x836   : >> { %2447 = vmatpush3.bf16.msra.mxu0 %v2616_v51  ;;  %v2657_v51 = vld [vmem:[#allocation18 + $0x10] sm:$0xff] (%p693_p6)  }
 0x837   : >> { %2448 = vmatprep.subr.bf16.mxu0 %v2958_v40 }
 0x83a   : >> { %2449 = vmatpush3.bf16.msra.mxu0 %v2617_v61 }
 0x83b   : >> { %2450 = vmatprep.subr.bf16.mxu0 %v2958_v40 }
 0x83e   : >> { %2451 = vmatpush3.bf16.msra.mxu0 %v2618_v63 }
 0x83f   : > { %2456 = vmatprep.subr.bf16.mxu0 (%p693_p6), %v2956_v5 }
 0x904   : >> { %v1719_v33 = vpop.f32.mrb[28].mxu0 }
 0x905   : >> { %v1720_v35 = vadd.f32 %v2239_v58, %v1719_v33  ;;  %v2430_v36 = vpop.f32.mrb[29].mxu0 }
 0x906   : >> { %v1722_v37 = vpop.f32.mrb[30].mxu0 }
 0x907   : >> { %v2431_v41 = vpop.f32.mrb[31].mxu0  ;;  %v1725_v42 = vadd.f32 %v1720_v35, %v3412_v38  ;;  %v2614_v38 = vld [vmem:[#allocation15 + $0x18] sm:$0xff]  }
 0x908   : >> { %2439 = vmatpush3.bf16.msra.mxu1 %v2614_v38  ;;  %v2655_v38 = vld [vmem:[#allocation18] sm:$0xff] (%p693_p6)  }
 0x909   : >> { %v1728_v43 = vsel %vm623_vm0, %v1725_v42, 0.0 }
 0x90a   : >> { %1729 = vadd.xlane.f32.xlu0 %v1728_v43 }
 0x997   : >> { %v1730_v45 = vpop.xlane.xlu0 %1729 }
 0x998   : >> { %v1731_v25 = vmul.f32 0.015625, %v1730_v45 }
 0x99a   : >> { %v1732_v46 = vsub.f32 %v1725_v42, %v1731_v25 }
 0x99c   : >> { %v1733_v34 = vmul.f32 %v1732_v46, %v1732_v46 }
 0x99e   : >> { %v1734_v47 = vsel %vm623_vm0, %v1733_v34, 0.0  ;;  %v2259_v34 = vld [vmem:[%s3756_s19] ss:$0 sm:$0xff]  ;;  %s3759_s19 = sld [smem:[#allocation34_spill]] (%p693_p6) }
 0x99f   : >> { %1735 = vadd.xlane.f32.xlu1 %v1734_v47 }
 0x9a4   : > { %s3656_s15 = scalar_lea.hbm (%p693_p6), %s3759_s19, %s2268_s12 }
 0xa2c   : >> { %v1736_v44 = vpop.xlane.xlu1 %1735 }
 0xa2d   : >> { %v1737_v53 = vmul.f32 0.015625, %v1736_v44  ;;  %v2658_v44 = vld [vmem:[#allocation18 + $0x18] sm:$0xff] (%p693_p6)  }
 0xa2f   : >> { %v1738_v54 = vadd.f32 1e-05, %v1737_v53 }
 0xa31   : >> { %2651 = vrsqrt.f32 %v1738_v54 }
 0xa3b   : >> { %v2652_v55 = vpop.eup %2651 }
 0xa3c   : >> { %v1740_v56 = vmul.f32 %v2652_v55, %v1732_v46 }
 0xa3e   : >> { %v1747_v23 = vmul.f32 %v2245_v48, %v1740_v56 }
 0xa40   : >> { %v1754_v52 = vadd.f32 %v2246_v59, %v1747_v23 }
 0xa42   : >> { %v1755_v60 = vpack.c.bf16 %v1754_v52, %v1754_v52 }
 0xa44   : >> { %2441 = vmatmul.mubr.msk.bf16.vlgmr.msra.gmra.mrb[40].mxu1 %vm623_vm0, %v1755_v60 }
 0xb17   : >> { %v1832_v1 = vpop.f32.mrb[40].mxu1 }
 0xb18   : >> { %v1833_v2 = vadd.f32 %v2247_v0, %v1832_v1  ;;  %v2442_v22 = vpop.f32.mrb[41].mxu1 }
 0xb19   : >> { %v1835_v24 = vpop.f32.mrb[42].mxu1 }
 0xb1a   : >> { %v1838_v26 = vmax.f32 %v1833_v2, 0.0  ;;  %v2443_v27 = vpop.f32.mrb[43].mxu1 }
 0xb1c   : >> { %v1839_v28 = vpack.c.bf16 %v1838_v26, %v1838_v26 }
 0xb1e   : >> { %2453 = vmatmul.mubr.msk.bf16.vlgmr.msra.gmra.mrb[32].mxu0 %vm623_vm0, %v1839_v28 }
 0xb1f   : > { %2464 = vmatprep.mubr.msk.bf16.mxu0 (%p693_p6), %vm2961_vm13, %v2956_v5  ;;  %2457 = vmatpush3.bf16.msra.mxu0 (%p693_p6), %v2655_v38 }
 0xb20   : > { %2458 = vmatprep.subr.bf16.mxu0 (%p693_p6), %v2956_v5 }
 0xb23   : > { %2459 = vmatpush3.bf16.msra.mxu0 (%p693_p6), %v2656_v57 }
 0xb24   : > { %2460 = vmatprep.subr.bf16.mxu0 (%p693_p6), %v2956_v5 }
 0xb27   : > { %2461 = vmatpush3.bf16.msra.mxu0 (%p693_p6), %v2657_v51 }
 0xb28   : > { %2462 = vmatprep.subr.bf16.mxu0 (%p693_p6), %v2956_v5 }
 0xb2b   : > { %2463 = vmatpush3.bf16.msra.mxu0 (%p693_p6), %v2658_v44 }
 0xbf1   : >> { %v1916_v40 = vpop.f32.mrb[32].mxu0 }
 0xbf2   : >> { %v1917_v30 = vadd.f32 %v2253_v29, %v1916_v40  ;;  %v2454_v62 = vpop.f32.mrb[33].mxu0 }
 0xbf3   : >> { %v1919_v31 = vpop.f32.mrb[34].mxu0 }
 0xbf4   : >> { %v2455_v32 = vpop.f32.mrb[35].mxu0  ;;  %v1922_v58 = vadd.f32 %v1917_v30, %v1754_v52 }
 0xbf6   : >> { %v1925_v33 = vsel %vm623_vm0, %v1922_v58, 0.0 }
 0xbf7   : >> { %1926 = vadd.xlane.f32.xlu0 %v1925_v33 }
 0xc84   : >> { %v1927_v35 = vpop.xlane.xlu0 %1926 }
 0xc85   : >> { %v1928_v36 = vmul.f32 0.015625, %v1927_v35 }
 0xc87   : >> { %v1929_v37 = vsub.f32 %v1922_v58, %v1928_v36 }
 0xc89   : >> { %v1930_v41 = vmul.f32 %v1929_v37, %v1929_v37 }
 0xc8b   : >> { %v1931_v42 = vsel %vm623_vm0, %v1930_v41, 0.0 }
 0xc8c   : >> { %1932 = vadd.xlane.f32.xlu1 %v1931_v42 }
 0xd19   : >> { %v1933_v43 = vpop.xlane.xlu1 %1932 }
 0xd1a   : >> { %v1934_v45 = vmul.f32 0.015625, %v1933_v43 }
 0xd1c   : >> { %v1935_v25 = vadd.f32 1e-05, %v1934_v45 }
 0xd1e   : >> { %2653 = vrsqrt.f32 %v1935_v25 }
 0xd28   : >> { %v2654_v46 = vpop.eup %2653 }
 0xd29   : >> { %v1937_v47 = vmul.f32 %v2654_v46, %v1929_v37  ;;  %695 = sbr.rel (!%p693_p6) target bundleno = 391 (0x187), region = 160 }
 0xd2b   : >> { %v1944_v49 = vmul.f32 %v2259_v34, %v1937_v47 }
 0xd2d   : >> { %v1951_v50 = vadd.f32 %v2260_v39, %v1944_v49 }
 0xd2f   : >> { %1952 = vst.msk [vmem:[#allocation2] sm:$0xff] %vm623_vm0, %v1951_v50 }
 0xd36   : > { %v1953_v53 = vld [vmem:[#allocation2] sm:$0xff] }
 0xd37   : > { %v1954_v3 = vpack.c.bf16 %v1953_v53, %v1953_v53 }
 0xd39   : > { %2465 = vmatmul.mubr.msk.bf16.vlgmr.msra.gmra.mrb[0].mxu0 %vm623_vm0, %v1954_v3 }
 0xe0c   : > { %v2031_v6 = vpop.f32.mrb[0].mxu0 }
 0xe0d   : > { %v2032_v7 = vadd.f32 %v2261_v4, %v2031_v6  ;;  %v2466_v8 = vpop.f32.mrb[1].mxu0 }
 0xe0e   : > { %v2034_v5 = vpop.f32.mrb[2].mxu0 }
 0xe0f   : > { %2037 = vst [vmem:[%s3405_s30] sm:$0xff] %v2032_v7  ;;  %v2467_v9 = vpop.f32.mrb[3].mxu0 }
 0xe10   : > { %2870 = shalt.err (!%p2867_p4)
}
 0xe11   : > { %s2871_s4 = scalar_lea.hbm %s3656_s15, 128  ;;  %s2875_s12 = scalar_lea.hbm %s3759_s19, 256 }
 0xe12   : > { %p2872_p10 = scmp.ne.s32.totalorder %s3656_s15, %s2871_s4  ;;  %p2876_p5 = scmp.lt.u32.totalorder %s3656_s15, %s3759_s19 }
 0xe13   : > { %p2877_p7 = scmp.lt.u32.totalorder %s2875_s12, %s2871_s4  ;;  %p2879_p9 = scmp.lt.u32.totalorder %s2871_s4, %s3656_s15 }
 0xe14   : > { %p2873_p11 = pnand %p2872_p10, %p3760_p12 }
 0xe15   : > { %p2878_p6 = por %p2877_p7, %p2876_p5 }
 0xe16   : > { %p2874_p8 = pneg %p2873_p11 }
 0xe17   : > { %p2880_p1 = por %p2879_p9, %p2878_p6 }
 0xe19   : > { %p2881_p13 = pnand %p2880_p1, %p2874_p8 }
 0xe1b   : > { %2884 = shalt.err (!%p2881_p13)
}
 0xe1c   : > { %2494 = dma.vmem_to_hbm [thread:$0]  (%p3760_p12), %s3658_s2, 128, %s3656_s15, %s2039_s0  }
 0xe1d PF: > { %s2064_s18 = sand.u32 1, %s2927_s21   ;;  %p3761_p0 = scmp.ne.s32.totalorder %s3743_s17, 0 }
 0xe1e   : > { %p3762_p2 = scmp.ge.s32.totalorder %s2939_s24, 2  ;;  %s2065_s27 = scalar_lea.sflag [#allocation9], %s2064_s18 }
 0xe20   : > { %p2520_p3 = pnand %p3762_p2, %p3761_p0 }
 0xe22   : > { %2922 = dma.done.wait (!%p2520_p3), %s2065_s27, 128  }
 0xe23   : > { %2924 = vsyncadd (!%p2520_p3), %s2065_s27, 4294967168  ;;  %p32_p4 = scmp.ge.s32.totalorder %s3242_s29, 4   ;;  %s3763_s21 = smov %s2931_s22 }
 0xe24   : > { %s3764_s22 = smov %s2935_s23  ;;  %s3765_s23 = smov %s3253_s20 }
 0xe25   : > { %s3766_s24 = smov %s3242_s29  ;;  %34 = sbr.rel (!%p32_p4) target bundleno = 19 (0x13), region = 171 }
 0xe2c   :  { %2070 = vsyncpa [#allocation8], 1 }
 0xe2d   :  { %2072 = vsyncpa [#allocation8 + $0x1], 1 }
 0xe2e   :  { %2073 = vsyncpa [#allocation11], 1 }
 0xe2f   :  { %2074 = vsyncpa [#allocation14], 1 }
 0xe30   :  { %2075 = vsyncpa [#allocation17], 1 }
 0xe31   :  { %2076 = vsyncpa [#allocation9], 1 }
 0xe32   :  { %2078 = vsyncpa [#allocation9 + $0x1], 1 }

</bundles_post_ra>
